<compile_context>
chip_gen: v7x
topology: tpu7x:2x2x1
jax: 0.10.0
libtpu: 0.0.40
codegen_flags: <defaults>
</compile_context>

<pallas_src>
import math
from functools import partial

import jax
import jax.numpy as jnp
from jax import lax
from jax.experimental import pallas as pl
from jax.experimental.pallas import tpu as pltpu


def _mhsa_flash_kernel(xq_ref, xkv_ref, wq_ref, bq_ref, wkv_ref, bkv_ref,
                       wo_ref, bo_ref, o_ref,
                       q_scr, m_scr, l_scr, acc_scr, kv_scr,
                       *, num_heads, head_size, kv_tile, seq_len,
                       matmul_dtype, approx_reciprocal, use_kv_cache,
                       mask_padded_keys):
    """One (batch, q-tile, kv-tile) grid step.

    xq_ref  : (1, H, tq)   query-side slab of x^T (resident across kv steps)
    xkv_ref : (1, H, tkv)  key/value-side slab of x^T (only read when qi == 0
                           in cache mode)
    wq_ref  : (H, H)       q weight, PyTorch (out, in), 1/sqrt(hd) pre-folded
    wkv_ref : (2H, H)      fused [k; v] weight, (out, in) layout
    wo_ref  : (H, H)       output weight, pre-transposed to (in, out)
    b*_ref  : f32 biases shaped to broadcast against the transposed slabs
    o_ref   : (1, tq, H)   output tile (written on the last kv step only)
    scratch : q (NH, hd, tq) matmul_dtype; m, l (NH, 1, tq) f32;
              acc (NH, hd, tq) f32; kv cache (2H, S_pad) matmul_dtype (or dummy)
    """
    hidden = num_heads * head_size
    qi = pl.program_id(1)
    ki = pl.program_id(2)
    nkv = pl.num_programs(2)

    @pl.when(ki == 0)
    def _init_q():
        # Project Q for this query tile once (scale & bias folded host-side
        # into wq / bq) and reset the online-softmax state.
        q_t = jnp.dot(wq_ref[...], xq_ref[0],
                      preferred_element_type=jnp.float32) + bq_ref[...]   # (H, tq)
        q_scr[...] = q_t.reshape(num_heads, head_size, -1).astype(matmul_dtype)
        m_scr[...] = jnp.full_like(m_scr, -jnp.inf)
        l_scr[...] = jnp.zeros_like(l_scr)
        acc_scr[...] = jnp.zeros_like(acc_scr)

    def _project_kv_tile():
        # Fused K|V projection for this kv tile: one wide (2H, H) MXU pass.
        kv_t = jnp.dot(wkv_ref[...], xkv_ref[0],
                       preferred_element_type=jnp.float32) + bkv_ref[...]  # (2H, tkv)
        return kv_t.astype(matmul_dtype)

    if use_kv_cache:
        # Projection is computed only on the first q-tile of each batch row and
        # cached in VMEM; later q-tiles read the cache (no redundant GEMM, no
        # redundant x HBM traffic).
        if kv_scr.shape[-1] == kv_tile:          # single kv tile: whole cache
            view = kv_scr
        else:                                    # multi-tile: kv_tile % 128 == 0
            k_start = pl.multiple_of(ki * kv_tile, 128)
            view = kv_scr.at[:, pl.ds(k_start, kv_tile)]

        @pl.when(qi == 0)
        def _fill_cache():
            view[...] = _project_kv_tile()

        kv_m = view[...]
    else:
        kv_m = _project_kv_tile()

    k3 = kv_m[:hidden, :].reshape(num_heads, head_size, -1)
    v3 = kv_m[hidden:, :].reshape(num_heads, head_size, -1)

    # scores^T: (NH, tkv, tq) == einsum('hdk,hdq->hkq', k, q).  Heads are a
    # leading batch dim, head_size is contracted directly -- no explicit .T.
    s = lax.dot_general(k3, q_scr[...],
                        dimension_numbers=(((1,), (1,)), ((0,), (0,))),
                        preferred_element_type=jnp.float32)

    if mask_padded_keys:
        # Keys beyond the true sequence length (host-side padding) must not
        # contribute to the softmax.
        kv_pos = ki * kv_tile + lax.broadcasted_iota(jnp.int32, s.shape, 1)
        s = jnp.where(kv_pos < seq_len, s, -1e30)

    # Online (flash) softmax along the kv axis (axis=1); statistics in f32.
    m_prev = m_scr[...]                                                 # (NH, 1, tq)
    m_new = jnp.maximum(m_prev, jnp.max(s, axis=1, keepdims=True))
    alpha = jnp.exp(m_prev - m_new)
    p = jnp.exp(s - m_new).astype(matmul_dtype)                         # (NH, tkv, tq)

    # Row-sum on the MXU (ones-row dot) instead of an XLU sublane reduce; this
    # also lets p drop to matmul_dtype immediately after the exp.
    ones_row = jnp.ones((num_heads, 1, kv_tile), matmul_dtype)
    l_part = lax.dot_general(ones_row, p,
                             dimension_numbers=(((2,), (1,)), ((0,), (0,))),
                             preferred_element_type=jnp.float32)        # (NH, 1, tq)
    # numerator update: (NH, hd, tq) == einsum('hdk,hkq->hdq', v, p)
    pv = lax.dot_general(v3, p,
                         dimension_numbers=(((2,), (1,)), ((0,), (0,))),
                         preferred_element_type=jnp.float32)

    l_scr[...] = alpha * l_scr[...] + l_part
    acc_scr[...] = alpha * acc_scr[...] + pv
    m_scr[...] = m_new

    @pl.when(ki == nkv - 1)
    def _finalize():
        inv_l = pl.reciprocal(l_scr[...], approx=approx_reciprocal)      # EUP slot
        heads_t = (acc_scr[...] * inv_l).reshape(hidden, -1)             # (H, tq)
        # out = concat @ Wo^T + bo with concat held transposed: contract the
        # hidden (sublane) dim of both operands -> lane-dense (tq, H) result.
        out = lax.dot_general(heads_t.astype(matmul_dtype), wo_ref[...],
                              dimension_numbers=(((0,), (0,)), ((), ())),
                              preferred_element_type=jnp.float32)
        o_ref[0] = (out + bo_ref[...]).astype(o_ref.dtype)


def _round_up(x, m):
    return ((x + m - 1) // m) * m


def _largest_tile(s_pad, cap):
    """Largest tile <= cap that divides s_pad; full-S_pad or a 128-multiple."""
    if s_pad <= cap:
        return s_pad
    best, t = 128, 128
    while t <= cap:
        if s_pad % t == 0:
            best = t
        t += 128
    return best


def multihead_self_attention(x, params, *, num_heads, q_tile=None, kv_tile=None,
                             matmul_dtype=jnp.bfloat16, approx_reciprocal=True,
                             single_buffer_weights=True):
    """x: (B, S, H).  params: PyTorch-layout weights (out, in) and biases."""
    B, S, H = x.shape
    assert H % num_heads == 0, "hidden_size must be divisible by num_heads"
    head_size = H // num_heads
    itemsize = jnp.dtype(matmul_dtype).itemsize
    # Packed dtypes (bf16: 16 rows / sublane tile) need head_size to cover whole
    # packed tiles so the (H, tq) -> (NH, hd, tq) reshape stays a pure regroup.
    min_hd = 8 * (4 // itemsize)
    assert head_size % min_hd == 0, (
        f"head_size={head_size} must be a multiple of {min_hd} "
        f"for matmul_dtype={jnp.dtype(matmul_dtype)}")

    # --- generation-aware VMEM budget & tile caps ---------------------------
    try:
        vmem_cap = int(pltpu.get_tpu_info().vmem_capacity_bytes)
    except Exception:
        vmem_cap = 64 * 1024 * 1024            # assume smallest (v7x per-TC) budget
    vmem_limit = int(vmem_cap * 0.75)          # 96 MiB on v5e/v6e, 48 MiB on v7x
    small_vmem = vmem_cap <= 64 * 1024 * 1024
    q_cap = 128 if small_vmem else 256
    kv_cap = 256 if small_vmem else 512
    # TODO(synk): on v5e (128x128 MXU) prefer q_tile=128 explicitly.

    # --- tiling & (optional) host-side seq padding, masked in-kernel --------
    if q_tile is None and kv_tile is None:
        if S <= q_cap and S <= kv_cap:
            s_pad, q_tile, kv_tile = S, S, S
        else:
            s_pad = _round_up(S, 128)
            q_tile = _largest_tile(s_pad, q_cap)
            kv_tile = _largest_tile(s_pad, kv_cap)
    else:
        q_tile = q_tile if q_tile is not None else kv_tile
        kv_tile = kv_tile if kv_tile is not None else q_tile
        s_pad = _round_up(S, math.lcm(q_tile, kv_tile))
    assert s_pad % q_tile == 0 and s_pad % kv_tile == 0
    assert q_tile == s_pad or q_tile % 128 == 0, "q_tile must be a 128-multiple"
    assert kv_tile == s_pad or kv_tile % 128 == 0, "kv_tile must be a 128-multiple"
    mask_padded_keys = s_pad != S
    n_q_tiles = s_pad // q_tile

    # --- VMEM KV cache: project K/V once per batch row ----------------------
    kv_cache_bytes = 2 * H * s_pad * itemsize
    use_kv_cache = (n_q_tiles > 1) and (kv_cache_bytes <= vmem_limit // 4)
    kv_cache_shape = (2 * H, s_pad) if use_kv_cache else (8, 128)   # dummy if off

    # --- weights: PyTorch (out, in) layout; fold 1/sqrt(hd) into q ----------
    scale = 1.0 / math.sqrt(float(head_size))
    wq = (params["wq"].astype(jnp.float32) * scale).astype(matmul_dtype)       # (H, H)
    bq = (params["bq"].astype(jnp.float32) * scale).reshape(H, 1)
    wkv = jnp.concatenate([params["wk"], params["wv"]], axis=0).astype(matmul_dtype)  # (2H, H)
    bkv = jnp.concatenate([params["bk"], params["bv"]]).astype(jnp.float32).reshape(2 * H, 1)
    wo = params["wo"].T.astype(matmul_dtype)                                   # (H, H) (in,out)
    bo = params["bo"].astype(jnp.float32).reshape(1, H)

    # Feature-major activations: (B, H, S_pad) -> hidden on sublanes, sequence
    # on lanes (layout plumbing done host-side, not in-kernel).
    if mask_padded_keys:
        x = jnp.pad(x, ((0, 0), (0, s_pad - S), (0, 0)))
    x_t = jnp.swapaxes(x, 1, 2).astype(matmul_dtype)

    grid = (B, n_q_tiles, s_pad // kv_tile)
    kernel = partial(_mhsa_flash_kernel, num_heads=num_heads, head_size=head_size,
                     kv_tile=kv_tile, seq_len=S, matmul_dtype=matmul_dtype,
                     approx_reciprocal=approx_reciprocal, use_kv_cache=use_kv_cache,
                     mask_padded_keys=mask_padded_keys)

    if use_kv_cache:
        # KV cache lives in per-core scratch -> all q-tiles of a batch row must
        # run on the same core; only the batch axis is megacore-parallel.
        # (On v7x with B == 1, callers can trade the cache for q-tile
        #  parallelism by passing a huge S / disabling via tiny kv cache.)
        semantics = ("parallel", "arbitrary", "arbitrary")
        xkv_map = lambda b, qi, ki: (b, 0, jnp.where(qi == 0, ki, 0))
    else:
        semantics = ("parallel", "parallel", "arbitrary")
        xkv_map = lambda b, qi, ki: (b, 0, ki)

    # Advisory cost estimate: Q/K/V/O projections once per token + attention.
    flops = B * (8 * s_pad * H * H + 4 * s_pad * s_pad * H)
    transcendentals = B * num_heads * s_pad * s_pad
    bytes_accessed = int(3 * B * s_pad * H * itemsize
                         + sum(int(w.size) * w.dtype.itemsize
                               for w in (wq, wkv, wo, bq, bkv, bo)))

    def _build_and_call(single_buffer):
        def const_spec(shape):
            # Grid-invariant operand: fetched once, VMEM-resident.  Single
            # buffering halves resident weight VMEM (matters inside v7x 64 MiB).
            if single_buffer:
                return pl.BlockSpec(shape, lambda b, qi, ki: (0, 0),
                                    pipeline_mode=pl.Buffered(1))
            return pl.BlockSpec(shape, lambda b, qi, ki: (0, 0))

        return pl.pallas_call(
            kernel,
            out_shape=jax.ShapeDtypeStruct((B, s_pad, H), x.dtype),
            grid_spec=pltpu.PrefetchScalarGridSpec(
                num_scalar_prefetch=0,
                grid=grid,
                in_specs=[
                    pl.BlockSpec((1, H, q_tile), lambda b, qi, ki: (b, 0, qi)),   # x^T, q slab
                    pl.BlockSpec((1, H, kv_tile), xkv_map),                       # x^T, kv slab
                    const_spec((H, H)),       # wq (scale folded)
                    const_spec((H, 1)),       # bq
                    const_spec((2 * H, H)),   # wkv (fused k|v)
                    const_spec((2 * H, 1)),   # bkv
                    const_spec((H, H)),       # wo (in, out)
                    const_spec((1, H)),       # bo
                ],
                out_specs=pl.BlockSpec((1, q_tile, H), lambda b, qi, ki: (b, qi, 0)),
                scratch_shapes=[
                    pltpu.VMEM((num_heads, head_size, q_tile), matmul_dtype),   # q
                    pltpu.VMEM((num_heads, 1, q_tile), jnp.float32),            # running max
                    pltpu.VMEM((num_heads, 1, q_tile), jnp.float32),            # running denom
                    pltpu.VMEM((num_heads, head_size, q_tile), jnp.float32),    # running numer
                    pltpu.VMEM(kv_cache_shape, matmul_dtype),                   # KV cache
                ],
            ),
            compiler_params=pltpu.CompilerParams(
                dimension_semantics=semantics,
                vmem_limit_bytes=vmem_limit),
            cost_estimate=pl.CostEstimate(flops=int(flops),
                                          transcendentals=int(transcendentals),
                                          bytes_accessed=bytes_accessed),
        )(x_t, x_t, wq, bq, wkv, bkv, wo, bo)

    if single_buffer_weights:
        try:
            out = _build_and_call(True)
        except Exception:
            # pl.Buffered(1) not supported on this JAX build -> default buffering.
            out = _build_and_call(False)
    else:
        out = _build_and_call(False)

    return out[:, :S, :] if mask_padded_keys else out


def _reference(x, params, *, num_heads):
    """Pure-JAX reference mirroring the PyTorch forward (mask=None, eval)."""
    B, S, H = x.shape
    hd = H // num_heads

    def lin(t, w, b):
        return t @ w.T + b

    q = lin(x, params["wq"], params["bq"]).reshape(B, S, num_heads, hd).transpose(0, 2, 1, 3)
    k = lin(x, params["wk"], params["bk"]).reshape(B, S, num_heads, hd).transpose(0, 2, 1, 3)
    v = lin(x, params["wv"], params["bv"]).reshape(B, S, num_heads, hd).transpose(0, 2, 1, 3)
    scores = jnp.einsum("bhqd,bhkd->bhqk", q, k) / jnp.sqrt(jnp.float32(hd))
    attn = jax.nn.softmax(scores, axis=-1)
    ao = jnp.einsum("bhqk,bhkd->bhqd", attn, v)
    concat = ao.transpose(0, 2, 1, 3).reshape(B, S, H)
    return lin(concat, params["wo"], params["bo"])


def _make_params(key, H):
    init = 1.0 / math.sqrt(H)
    names = ["wq", "bq", "wk", "bk", "wv", "bv", "wo", "bo"]
    ks = jax.random.split(key, len(names))
    params = {}
    for k, name in zip(ks, names):
        shape = (H, H) if name.startswith("w") else (H,)
        params[name] = jax.random.uniform(k, shape, jnp.float32, -init, init)
    return params


if __name__ == "__main__":
    key = jax.random.PRNGKey(0)

    # 1) Small smoke test (tiny module-like shapes): strict f32 validation
    #    build + bf16 performance build (single q/kv tile path).
    k1, k2, key = jax.random.split(key, 3)
    B, S, H, NH = 2, 8, 32, 2           # head_size = 16
    params = _make_params(k1, H)
    x = jax.random.normal(k2, (B, S, H), jnp.float32)
    with jax.default_matmul_precision("highest"):
        ref = _reference(x, params, num_heads=NH)
    out = jax.block_until_ready(
        multihead_self_attention(x, params, num_heads=NH,
                                 matmul_dtype=jnp.float32, approx_reciprocal=False))
    assert out.shape == (B, S, H)
    assert jnp.allclose(out, ref, atol=1e-4, rtol=1e-4), "small f32 mismatch"
    out_bf = jax.block_until_ready(multihead_self_attention(x, params, num_heads=NH))
    assert jnp.allclose(out_bf, ref, atol=5e-2, rtol=5e-2), "small bf16 mismatch"

    # 2) Multi-tile test: exercises the online-softmax carry across kv tiles,
    #    KV-cache reuse across q tiles, and the (8,128)-tiled BlockSpec path.
    k1, k2, key = jax.random.split(key, 3)
    B, S, H, NH = 2, 512, 256, 4        # head_size = 64; grid (2, 4, 4)
    params = _make_params(k1, H)
    x = jax.random.normal(k2, (B, S, H), jnp.float32)
    with jax.default_matmul_precision("highest"):
        ref = _reference(x, params, num_heads=NH)
    out = jax.block_until_ready(
        multihead_self_attention(x, params, num_heads=NH, q_tile=128, kv_tile=128,
                                 matmul_dtype=jnp.float32, approx_reciprocal=False))
    assert jnp.allclose(out, ref, atol=2e-3, rtol=2e-3), "multi-tile f32 mismatch"
    out_bf = jax.block_until_ready(
        multihead_self_attention(x, params, num_heads=NH, q_tile=128, kv_tile=128))
    assert jnp.allclose(out_bf, ref, atol=5e-2, rtol=5e-2), "multi-tile bf16 mismatch"

    # 3) Ragged sequence: S not a tile multiple -> host-side padding plus
    #    in-kernel masking of the padded keys.
    k1, k2, key = jax.random.split(key, 3)
    B, S, H, NH = 1, 200, 128, 2        # head_size = 64; padded to 256
    params = _make_params(k1, H)
    x = jax.random.normal(k2, (B, S, H), jnp.float32)
    with jax.default_matmul_precision("highest"):
        ref = _reference(x, params, num_heads=NH)
    out = jax.block_until_ready(
        multihead_self_attention(x, params, num_heads=NH, q_tile=128, kv_tile=128,
                                 matmul_dtype=jnp.float32, approx_reciprocal=False))
    assert out.shape == (B, S, H)
    assert jnp.allclose(out, ref, atol=2e-3, rtol=2e-3), "padded f32 mismatch"

    print("KERNEL_OK")
</pallas_src>

<mosaic_0001>
module attributes {stable_mosaic.version = 11 : i64} {
  func.func @_mhsa_flash_kernel(%arg0: i32, %arg1: i32, %arg2: i32, %arg3: memref<1x32x8xf32, #tpu.memory_space<vmem>>, %arg4: memref<1x32x8xf32, #tpu.memory_space<vmem>>, %arg5: memref<32x32xf32, #tpu.memory_space<vmem>>, %arg6: memref<32x1xf32, #tpu.memory_space<vmem>>, %arg7: memref<64x32xf32, #tpu.memory_space<vmem>>, %arg8: memref<64x1xf32, #tpu.memory_space<vmem>>, %arg9: memref<32x32xf32, #tpu.memory_space<vmem>>, %arg10: memref<1x32xf32, #tpu.memory_space<vmem>>, %arg11: memref<1x8x32xf32, #tpu.memory_space<vmem>>, %arg12: memref<2x16x8xf32, #tpu.memory_space<vmem>>, %arg13: memref<2x1x8xf32, #tpu.memory_space<vmem>>, %arg14: memref<2x1x8xf32, #tpu.memory_space<vmem>>, %arg15: memref<2x16x8xf32, #tpu.memory_space<vmem>>, %arg16: memref<8x128xf32, #tpu.memory_space<vmem>>) attributes {dimension_semantics = [#tpu.dimension_semantics<parallel>, #tpu.dimension_semantics<parallel>, #tpu.dimension_semantics<arbitrary>], iteration_bounds = array<i64: 2, 1, 1>, scalar_prefetch = 0 : i64, scratch_operands = 5 : i64, tpu.core_type = #tpu.core_type<tc>, window_params = [{transform_indices = @transform_0, window_bounds = array<i64: 1, 32, 8>}, {transform_indices = @transform_1, window_bounds = array<i64: 1, 32, 8>}, {pipeline_mode = #tpu.pipeline_mode<synchronous>, transform_indices = @transform_2, window_bounds = array<i64: 32, 32>}, {pipeline_mode = #tpu.pipeline_mode<synchronous>, transform_indices = @transform_3, window_bounds = array<i64: 32, 1>}, {pipeline_mode = #tpu.pipeline_mode<synchronous>, transform_indices = @transform_4, window_bounds = array<i64: 64, 32>}, {pipeline_mode = #tpu.pipeline_mode<synchronous>, transform_indices = @transform_5, window_bounds = array<i64: 64, 1>}, {pipeline_mode = #tpu.pipeline_mode<synchronous>, transform_indices = @transform_6, window_bounds = array<i64: 32, 32>}, {pipeline_mode = #tpu.pipeline_mode<synchronous>, transform_indices = @transform_7, window_bounds = array<i64: 1, 32>}, {transform_indices = @transform_8, window_bounds = array<i64: 1, 8, 32>}]} {
    %c0_i32 = arith.constant 0 : i32
    %0 = arith.cmpi eq, %arg2, %c0_i32 : i32
    %1 = arith.extui %0 : i1 to i32
    %c0_i32_0 = arith.constant 0 : i32
    %2 = arith.cmpi ne, %1, %c0_i32_0 : i32
    scf.if %2 {
      %c0_35 = arith.constant 0 : index
      %c0_36 = arith.constant 0 : index
      %41 = vector.load %arg5[%c0_35, %c0_36] : memref<32x32xf32, #tpu.memory_space<vmem>>, vector<32x32xf32>
      %c0_37 = arith.constant 0 : index
      %c0_38 = arith.constant 0 : index
      %c0_39 = arith.constant 0 : index
      %42 = vector.load %arg3[%c0_37, %c0_38, %c0_39] : memref<1x32x8xf32, #tpu.memory_space<vmem>>, vector<1x32x8xf32>
      %43 = vector.shape_cast %42 : vector<1x32x8xf32> to vector<32x8xf32>
      %cst_40 = arith.constant dense<0.000000e+00> : vector<32x8xf32>
      %44 = tpu.matmul %41, %43, %cst_40 {dimension_numbers = #tpu.dot_dimension_numbers<[1], [0], [0], [1], [0, 0, 1, 1], [], []>} : vector<32x32xf32>, vector<32x8xf32>, vector<32x8xf32> -> vector<32x8xf32>
      %c0_41 = arith.constant 0 : index
      %c0_42 = arith.constant 0 : index
      %45 = vector.load %arg6[%c0_41, %c0_42] : memref<32x1xf32, #tpu.memory_space<vmem>>, vector<32x1xf32>
      %46 = vector.broadcast %45 : vector<32x1xf32> to vector<32x8xf32>
      %47 = arith.addf %44, %46 : vector<32x8xf32>
      %48 = vector.shape_cast %47 : vector<32x8xf32> to vector<2x16x8xf32>
      %c0_43 = arith.constant 0 : index
      %c0_44 = arith.constant 0 : index
      %c0_45 = arith.constant 0 : index
      %49 = vector.load %arg12[%c0_43, %c0_44, %c0_45] : memref<2x16x8xf32, #tpu.memory_space<vmem>>, vector<2x16x8xf32>
      tpu.vector_store %arg12[%c0_43, %c0_44, %c0_45], %48 {strides = array<i32>} : memref<2x16x8xf32, #tpu.memory_space<vmem>>, vector<2x16x8xf32>,
      %cst_46 = arith.constant 0xFF800000 : f32
      %50 = vector.broadcast %cst_46 : f32 to vector<2x1x8xf32>
      %c0_47 = arith.constant 0 : index
      %c0_48 = arith.constant 0 : index
      %c0_49 = arith.constant 0 : index
      %51 = vector.load %arg13[%c0_47, %c0_48, %c0_49] : memref<2x1x8xf32, #tpu.memory_space<vmem>>, vector<2x1x8xf32>
      tpu.vector_store %arg13[%c0_47, %c0_48, %c0_49], %50 {strides = array<i32>} : memref<2x1x8xf32, #tpu.memory_space<vmem>>, vector<2x1x8xf32>,
      %cst_50 = arith.constant 0.000000e+00 : f32
      %52 = vector.broadcast %cst_50 : f32 to vector<2x1x8xf32>
      %c0_51 = arith.constant 0 : index
      %c0_52 = arith.constant 0 : index
      %c0_53 = arith.constant 0 : index
      %53 = vector.load %arg14[%c0_51, %c0_52, %c0_53] : memref<2x1x8xf32, #tpu.memory_space<vmem>>, vector<2x1x8xf32>
      tpu.vector_store %arg14[%c0_51, %c0_52, %c0_53], %52 {strides = array<i32>} : memref<2x1x8xf32, #tpu.memory_space<vmem>>, vector<2x1x8xf32>,
      %cst_54 = arith.constant 0.000000e+00 : f32
      %54 = vector.broadcast %cst_54 : f32 to vector<2x16x8xf32>
      %c0_55 = arith.constant 0 : index
      %c0_56 = arith.constant 0 : index
      %c0_57 = arith.constant 0 : index
      %55 = vector.load %arg15[%c0_55, %c0_56, %c0_57] : memref<2x16x8xf32, #tpu.memory_space<vmem>>, vector<2x16x8xf32>
      tpu.vector_store %arg15[%c0_55, %c0_56, %c0_57], %54 {strides = array<i32>} : memref<2x16x8xf32, #tpu.memory_space<vmem>>, vector<2x16x8xf32>,
    } else {
    }
    %c0 = arith.constant 0 : index
    %c0_1 = arith.constant 0 : index
    %3 = vector.load %arg7[%c0, %c0_1] : memref<64x32xf32, #tpu.memory_space<vmem>>, vector<64x32xf32>
    %c0_2 = arith.constant 0 : index
    %c0_3 = arith.constant 0 : index
    %c0_4 = arith.constant 0 : index
    %4 = vector.load %arg4[%c0_2, %c0_3, %c0_4] : memref<1x32x8xf32, #tpu.memory_space<vmem>>, vector<1x32x8xf32>
    %5 = vector.shape_cast %4 : vector<1x32x8xf32> to vector<32x8xf32>
    %cst = arith.constant dense<0.000000e+00> : vector<64x8xf32>
    %6 = tpu.matmul %3, %5, %cst {dimension_numbers = #tpu.dot_dimension_numbers<[1], [0], [0], [1], [0, 0, 1, 1], [], []>} : vector<64x32xf32>, vector<32x8xf32>, vector<64x8xf32> -> vector<64x8xf32>
    %c0_5 = arith.constant 0 : index
    %c0_6 = arith.constant 0 : index
    %7 = vector.load %arg8[%c0_5, %c0_6] : memref<64x1xf32, #tpu.memory_space<vmem>>, vector<64x1xf32>
    %8 = vector.broadcast %7 : vector<64x1xf32> to vector<64x8xf32>
    %9 = arith.addf %6, %8 : vector<64x8xf32>
    %10 = vector.extract_strided_slice %9 {offsets = [0, 0], sizes = [32, 8], strides = [1, 1]} : vector<64x8xf32> to vector<32x8xf32>
    %11 = vector.shape_cast %10 : vector<32x8xf32> to vector<2x16x8xf32>
    %12 = vector.extract_strided_slice %9 {offsets = [32, 0], sizes = [32, 8], strides = [1, 1]} : vector<64x8xf32> to vector<32x8xf32>
    %13 = vector.shape_cast %12 : vector<32x8xf32> to vector<2x16x8xf32>
    %c0_7 = arith.constant 0 : index
    %c0_8 = arith.constant 0 : index
    %c0_9 = arith.constant 0 : index
    %14 = vector.load %arg12[%c0_7, %c0_8, %c0_9] : memref<2x16x8xf32, #tpu.memory_space<vmem>>, vector<2x16x8xf32>
    %cst_10 = arith.constant dense<0.000000e+00> : vector<2x8x8xf32>
    %15 = tpu.matmul %11, %14, %cst_10 {dimension_numbers = #tpu.dot_dimension_numbers<[1], [1], [2], [2], [0, 0, 0, 2, 1, 2], [0], [0]>} : vector<2x16x8xf32>, vector<2x16x8xf32>, vector<2x8x8xf32> -> vector<2x8x8xf32>
    %c0_11 = arith.constant 0 : index
    %c0_12 = arith.constant 0 : index
    %c0_13 = arith.constant 0 : index
    %16 = vector.load %arg13[%c0_11, %c0_12, %c0_13] : memref<2x1x8xf32, #tpu.memory_space<vmem>>, vector<2x1x8xf32>
    %cst_14 = arith.constant dense<0xFF800000> : vector<2x8xf32>
    %17 = vector.multi_reduction <maximumf>, %15, %cst_14 [1] : vector<2x8x8xf32> to vector<2x8xf32>
    %18 = vector.shape_cast %17 : vector<2x8xf32> to vector<2x1x8xf32>
    %19 = arith.maximumf %16, %18 : vector<2x1x8xf32>
    %20 = arith.subf %16, %19 : vector<2x1x8xf32>
    %21 = math.exp %20 : vector<2x1x8xf32>
    %22 = vector.broadcast %19 : vector<2x1x8xf32> to vector<2x8x8xf32>
    %23 = arith.subf %15, %22 : vector<2x8x8xf32>
    %24 = math.exp %23 : vector<2x8x8xf32>
    %cst_15 = arith.constant 1.000000e+00 : f32
    %25 = vector.broadcast %cst_15 : f32 to vector<2x1x8xf32>
    %cst_16 = arith.constant dense<0.000000e+00> : vector<2x1x8xf32>
    %26 = tpu.matmul %25, %24, %cst_16 {dimension_numbers = #tpu.dot_dimension_numbers<[2], [1], [1], [2], [0, 0, 0, 1, 1, 2], [0], [0]>} : vector<2x1x8xf32>, vector<2x8x8xf32>, vector<2x1x8xf32> -> vector<2x1x8xf32>
    %cst_17 = arith.constant dense<0.000000e+00> : vector<2x16x8xf32>
    %27 = tpu.matmul %13, %24, %cst_17 {dimension_numbers = #tpu.dot_dimension_numbers<[2], [1], [1], [2], [0, 0, 0, 1, 1, 2], [0], [0]>} : vector<2x16x8xf32>, vector<2x8x8xf32>, vector<2x16x8xf32> -> vector<2x16x8xf32>
    %c0_18 = arith.constant 0 : index
    %c0_19 = arith.constant 0 : index
    %c0_20 = arith.constant 0 : index
    %28 = vector.load %arg14[%c0_18, %c0_19, %c0_20] : memref<2x1x8xf32, #tpu.memory_space<vmem>>, vector<2x1x8xf32>
    %29 = arith.mulf %21, %28 : vector<2x1x8xf32>
    %30 = arith.addf %29, %26 : vector<2x1x8xf32>
    %c0_21 = arith.constant 0 : index
    %c0_22 = arith.constant 0 : index
    %c0_23 = arith.constant 0 : index
    %31 = vector.load %arg14[%c0_21, %c0_22, %c0_23] : memref<2x1x8xf32, #tpu.memory_space<vmem>>, vector<2x1x8xf32>
    tpu.vector_store %arg14[%c0_21, %c0_22, %c0_23], %30 {strides = array<i32>} : memref<2x1x8xf32, #tpu.memory_space<vmem>>, vector<2x1x8xf32>,
    %c0_24 = arith.constant 0 : index
    %c0_25 = arith.constant 0 : index
    %c0_26 = arith.constant 0 : index
    %32 = vector.load %arg15[%c0_24, %c0_25, %c0_26] : memref<2x16x8xf32, #tpu.memory_space<vmem>>, vector<2x16x8xf32>
    %33 = vector.broadcast %21 : vector<2x1x8xf32> to vector<2x16x8xf32>
    %34 = arith.mulf %33, %32 : vector<2x16x8xf32>
    %35 = arith.addf %34, %27 : vector<2x16x8xf32>
    %c0_27 = arith.constant 0 : index
    %c0_28 = arith.constant 0 : index
    %c0_29 = arith.constant 0 : index
    %36 = vector.load %arg15[%c0_27, %c0_28, %c0_29] : memref<2x16x8xf32, #tpu.memory_space<vmem>>, vector<2x16x8xf32>
    tpu.vector_store %arg15[%c0_27, %c0_28, %c0_29], %35 {strides = array<i32>} : memref<2x16x8xf32, #tpu.memory_space<vmem>>, vector<2x16x8xf32>,
    %c0_30 = arith.constant 0 : index
    %c0_31 = arith.constant 0 : index
    %c0_32 = arith.constant 0 : index
    %37 = vector.load %arg13[%c0_30, %c0_31, %c0_32] : memref<2x1x8xf32, #tpu.memory_space<vmem>>, vector<2x1x8xf32>
    tpu.vector_store %arg13[%c0_30, %c0_31, %c0_32], %19 {strides = array<i32>} : memref<2x1x8xf32, #tpu.memory_space<vmem>>, vector<2x1x8xf32>,
    %c0_i32_33 = arith.constant 0 : i32
    %38 = arith.cmpi eq, %arg2, %c0_i32_33 : i32
    %39 = arith.extui %38 : i1 to i32
    %c0_i32_34 = arith.constant 0 : i32
    %40 = arith.cmpi ne, %39, %c0_i32_34 : i32
    scf.if %40 {
      %c0_35 = arith.constant 0 : index
      %c0_36 = arith.constant 0 : index
      %c0_37 = arith.constant 0 : index
      %41 = vector.load %arg14[%c0_35, %c0_36, %c0_37] : memref<2x1x8xf32, #tpu.memory_space<vmem>>, vector<2x1x8xf32>
      %42 = tpu.reciprocal %41 : vector<2x1x8xf32> -> vector<2x1x8xf32>
      %c0_38 = arith.constant 0 : index
      %c0_39 = arith.constant 0 : index
      %c0_40 = arith.constant 0 : index
      %43 = vector.load %arg15[%c0_38, %c0_39, %c0_40] : memref<2x16x8xf32, #tpu.memory_space<vmem>>, vector<2x16x8xf32>
      %44 = vector.broadcast %42 : vector<2x1x8xf32> to vector<2x16x8xf32>
      %45 = arith.mulf %43, %44 : vector<2x16x8xf32>
      %46 = vector.shape_cast %45 : vector<2x16x8xf32> to vector<32x8xf32>
      %c0_41 = arith.constant 0 : index
      %c0_42 = arith.constant 0 : index
      %47 = vector.load %arg9[%c0_41, %c0_42] : memref<32x32xf32, #tpu.memory_space<vmem>>, vector<32x32xf32>
      %cst_43 = arith.constant dense<0.000000e+00> : vector<8x32xf32>
      %48 = tpu.matmul %46, %47, %cst_43 {dimension_numbers = #tpu.dot_dimension_numbers<[0], [0], [1], [1], [0, 1, 1, 1], [], []>} : vector<32x8xf32>, vector<32x32xf32>, vector<8x32xf32> -> vector<8x32xf32>
      %c0_44 = arith.constant 0 : index
      %c0_45 = arith.constant 0 : index
      %49 = vector.load %arg10[%c0_44, %c0_45] : memref<1x32xf32, #tpu.memory_space<vmem>>, vector<1x32xf32>
      %50 = vector.broadcast %49 : vector<1x32xf32> to vector<8x32xf32>
      %51 = arith.addf %48, %50 : vector<8x32xf32>
      %c0_46 = arith.constant 0 : index
      %c0_47 = arith.constant 0 : index
      %c0_48 = arith.constant 0 : index
      %52 = vector.load %arg11[%c0_46, %c0_47, %c0_48] : memref<1x8x32xf32, #tpu.memory_space<vmem>>, vector<1x8x32xf32>
      %53 = vector.shape_cast %52 : vector<1x8x32xf32> to vector<8x32xf32>
      %54 = vector.shape_cast %51 : vector<8x32xf32> to vector<1x8x32xf32>
      tpu.vector_store %arg11[%c0_46, %c0_47, %c0_48], %54 {strides = array<i32>} : memref<1x8x32xf32, #tpu.memory_space<vmem>>, vector<1x8x32xf32>,
    } else {
    }
    return
  }
  func.func @transform_0(%arg0: i32, %arg1: i32, %arg2: i32) -> (i32, i32, i32) {
    %c0_i32 = arith.constant 0 : i32
    %c0_i32_0 = arith.constant 0 : i32
    return %arg0, %c0_i32, %arg1 : i32, i32, i32
  }
  func.func @transform_1(%arg0: i32, %arg1: i32, %arg2: i32) -> (i32, i32, i32) {
    %c0_i32 = arith.constant 0 : i32
    %c0_i32_0 = arith.constant 0 : i32
    return %arg0, %c0_i32, %arg2 : i32, i32, i32
  }
  func.func @transform_2(%arg0: i32, %arg1: i32, %arg2: i32) -> (i32, i32) {
    %c0_i32 = arith.constant 0 : i32
    %c0_i32_0 = arith.constant 0 : i32
    %c0_i32_1 = arith.constant 0 : i32
    return %c0_i32, %c0_i32_0 : i32, i32
  }
  func.func @transform_3(%arg0: i32, %arg1: i32, %arg2: i32) -> (i32, i32) {
    %c0_i32 = arith.constant 0 : i32
    %c0_i32_0 = arith.constant 0 : i32
    %c0_i32_1 = arith.constant 0 : i32
    return %c0_i32, %c0_i32_0 : i32, i32
  }
  func.func @transform_4(%arg0: i32, %arg1: i32, %arg2: i32) -> (i32, i32) {
    %c0_i32 = arith.constant 0 : i32
    %c0_i32_0 = arith.constant 0 : i32
    %c0_i32_1 = arith.constant 0 : i32
    return %c0_i32, %c0_i32_0 : i32, i32
  }
  func.func @transform_5(%arg0: i32, %arg1: i32, %arg2: i32) -> (i32, i32) {
    %c0_i32 = arith.constant 0 : i32
    %c0_i32_0 = arith.constant 0 : i32
    %c0_i32_1 = arith.constant 0 : i32
    return %c0_i32, %c0_i32_0 : i32, i32
  }
  func.func @transform_6(%arg0: i32, %arg1: i32, %arg2: i32) -> (i32, i32) {
    %c0_i32 = arith.constant 0 : i32
    %c0_i32_0 = arith.constant 0 : i32
    %c0_i32_1 = arith.constant 0 : i32
    return %c0_i32, %c0_i32_0 : i32, i32
  }
  func.func @transform_7(%arg0: i32, %arg1: i32, %arg2: i32) -> (i32, i32) {
    %c0_i32 = arith.constant 0 : i32
    %c0_i32_0 = arith.constant 0 : i32
    %c0_i32_1 = arith.constant 0 : i32
    return %c0_i32, %c0_i32_0 : i32, i32
  }
  func.func @transform_8(%arg0: i32, %arg1: i32, %arg2: i32) -> (i32, i32, i32) {
    %c0_i32 = arith.constant 0 : i32
    %c0_i32_0 = arith.constant 0 : i32
    return %arg0, %arg1, %c0_i32 : i32, i32, i32
  }
}

module attributes {stable_mosaic.version = 11 : i64} {
  func.func @_mhsa_flash_kernel(%arg0: i32, %arg1: i32, %arg2: i32, %arg3: memref<1x32x8xf32, #tpu.memory_space<vmem>>, %arg4: memref<1x32x8xf32, #tpu.memory_space<vmem>>, %arg5: memref<32x32xf32, #tpu.memory_space<vmem>>, %arg6: memref<32x1xf32, #tpu.memory_space<vmem>>, %arg7: memref<64x32xf32, #tpu.memory_space<vmem>>, %arg8: memref<64x1xf32, #tpu.memory_space<vmem>>, %arg9: memref<32x32xf32, #tpu.memory_space<vmem>>, %arg10: memref<1x32xf32, #tpu.memory_space<vmem>>, %arg11: memref<1x8x32xf32, #tpu.memory_space<vmem>>, %arg12: memref<2x16x8xf32, #tpu.memory_space<vmem>>, %arg13: memref<2x1x8xf32, #tpu.memory_space<vmem>>, %arg14: memref<2x1x8xf32, #tpu.memory_space<vmem>>, %arg15: memref<2x16x8xf32, #tpu.memory_space<vmem>>, %arg16: memref<8x128xf32, #tpu.memory_space<vmem>>) attributes {dimension_semantics = [#tpu.dimension_semantics<parallel>, #tpu.dimension_semantics<parallel>, #tpu.dimension_semantics<arbitrary>], iteration_bounds = array<i64: 2, 1, 1>, scalar_prefetch = 0 : i64, scratch_operands = 5 : i64, tpu.core_type = #tpu.core_type<tc>, window_params = [{transform_indices = @transform_0, window_bounds = array<i64: 1, 32, 8>}, {transform_indices = @transform_1, window_bounds = array<i64: 1, 32, 8>}, {pipeline_mode = #tpu.pipeline_mode<synchronous>, transform_indices = @transform_2, window_bounds = array<i64: 32, 32>}, {pipeline_mode = #tpu.pipeline_mode<synchronous>, transform_indices = @transform_3, window_bounds = array<i64: 32, 1>}, {pipeline_mode = #tpu.pipeline_mode<synchronous>, transform_indices = @transform_4, window_bounds = array<i64: 64, 32>}, {pipeline_mode = #tpu.pipeline_mode<synchronous>, transform_indices = @transform_5, window_bounds = array<i64: 64, 1>}, {pipeline_mode = #tpu.pipeline_mode<synchronous>, transform_indices = @transform_6, window_bounds = array<i64: 32, 32>}, {pipeline_mode = #tpu.pipeline_mode<synchronous>, transform_indices = @transform_7, window_bounds = array<i64: 1, 32>}, {transform_indices = @transform_8, window_bounds = array<i64: 1, 8, 32>}]} {
    %c0_i32 = arith.constant 0 : i32
    %0 = arith.cmpi eq, %arg2, %c0_i32 : i32
    %1 = arith.extui %0 : i1 to i32
    %c0_i32_0 = arith.constant 0 : i32
    %2 = arith.cmpi ne, %1, %c0_i32_0 : i32
    scf.if %2 {
      %c0_35 = arith.constant 0 : index
      %c0_36 = arith.constant 0 : index
      %41 = vector.load %arg5[%c0_35, %c0_36] : memref<32x32xf32, #tpu.memory_space<vmem>>, vector<32x32xf32>
      %c0_37 = arith.constant 0 : index
      %c0_38 = arith.constant 0 : index
      %c0_39 = arith.constant 0 : index
      %42 = vector.load %arg3[%c0_37, %c0_38, %c0_39] : memref<1x32x8xf32, #tpu.memory_space<vmem>>, vector<1x32x8xf32>
      %43 = vector.shape_cast %42 : vector<1x32x8xf32> to vector<32x8xf32>
      %cst_40 = arith.constant dense<0.000000e+00> : vector<32x8xf32>
      %44 = tpu.matmul %41, %43, %cst_40 {dimension_numbers = #tpu.dot_dimension_numbers<[1], [0], [0], [1], [0, 0, 1, 1], [], []>} : vector<32x32xf32>, vector<32x8xf32>, vector<32x8xf32> -> vector<32x8xf32>
      %c0_41 = arith.constant 0 : index
      %c0_42 = arith.constant 0 : index
      %45 = vector.load %arg6[%c0_41, %c0_42] : memref<32x1xf32, #tpu.memory_space<vmem>>, vector<32x1xf32>
      %46 = vector.broadcast %45 : vector<32x1xf32> to vector<32x8xf32>
      %47 = arith.addf %44, %46 : vector<32x8xf32>
      %48 = vector.shape_cast %47 : vector<32x8xf32> to vector<2x16x8xf32>
      %c0_43 = arith.constant 0 : index
      %c0_44 = arith.constant 0 : index
      %c0_45 = arith.constant 0 : index
      %49 = vector.load %arg12[%c0_43, %c0_44, %c0_45] : memref<2x16x8xf32, #tpu.memory_space<vmem>>, vector<2x16x8xf32>
      tpu.vector_store %arg12[%c0_43, %c0_44, %c0_45], %48 {strides = array<i32>} : memref<2x16x8xf32, #tpu.memory_space<vmem>>, vector<2x16x8xf32>,
      %cst_46 = arith.constant 0xFF800000 : f32
      %50 = vector.broadcast %cst_46 : f32 to vector<2x1x8xf32>
      %c0_47 = arith.constant 0 : index
      %c0_48 = arith.constant 0 : index
      %c0_49 = arith.constant 0 : index
      %51 = vector.load %arg13[%c0_47, %c0_48, %c0_49] : memref<2x1x8xf32, #tpu.memory_space<vmem>>, vector<2x1x8xf32>
      tpu.vector_store %arg13[%c0_47, %c0_48, %c0_49], %50 {strides = array<i32>} : memref<2x1x8xf32, #tpu.memory_space<vmem>>, vector<2x1x8xf32>,
      %cst_50 = arith.constant 0.000000e+00 : f32
      %52 = vector.broadcast %cst_50 : f32 to vector<2x1x8xf32>
      %c0_51 = arith.constant 0 : index
      %c0_52 = arith.constant 0 : index
      %c0_53 = arith.constant 0 : index
      %53 = vector.load %arg14[%c0_51, %c0_52, %c0_53] : memref<2x1x8xf32, #tpu.memory_space<vmem>>, vector<2x1x8xf32>
      tpu.vector_store %arg14[%c0_51, %c0_52, %c0_53], %52 {strides = array<i32>} : memref<2x1x8xf32, #tpu.memory_space<vmem>>, vector<2x1x8xf32>,
      %cst_54 = arith.constant 0.000000e+00 : f32
      %54 = vector.broadcast %cst_54 : f32 to vector<2x16x8xf32>
      %c0_55 = arith.constant 0 : index
      %c0_56 = arith.constant 0 : index
      %c0_57 = arith.constant 0 : index
      %55 = vector.load %arg15[%c0_55, %c0_56, %c0_57] : memref<2x16x8xf32, #tpu.memory_space<vmem>>, vector<2x16x8xf32>
      tpu.vector_store %arg15[%c0_55, %c0_56, %c0_57], %54 {strides = array<i32>} : memref<2x16x8xf32, #tpu.memory_space<vmem>>, vector<2x16x8xf32>,
    } else {
    }
    %c0 = arith.constant 0 : index
    %c0_1 = arith.constant 0 : index
    %3 = vector.load %arg7[%c0, %c0_1] : memref<64x32xf32, #tpu.memory_space<vmem>>, vector<64x32xf32>
    %c0_2 = arith.constant 0 : index
    %c0_3 = arith.constant 0 : index
    %c0_4 = arith.constant 0 : index
    %4 = vector.load %arg4[%c0_2, %c0_3, %c0_4] : memref<1x32x8xf32, #tpu.memory_space<vmem>>, vector<1x32x8xf32>
    %5 = vector.shape_cast %4 : vector<1x32x8xf32> to vector<32x8xf32>
    %cst = arith.constant dense<0.000000e+00> : vector<64x8xf32>
    %6 = tpu.matmul %3, %5, %cst {dimension_numbers = #tpu.dot_dimension_numbers<[1], [0], [0], [1], [0, 0, 1, 1], [], []>} : vector<64x32xf32>, vector<32x8xf32>, vector<64x8xf32> -> vector<64x8xf32>
    %c0_5 = arith.constant 0 : index
    %c0_6 = arith.constant 0 : index
    %7 = vector.load %arg8[%c0_5, %c0_6] : memref<64x1xf32, #tpu.memory_space<vmem>>, vector<64x1xf32>
    %8 = vector.broadcast %7 : vector<64x1xf32> to vector<64x8xf32>
    %9 = arith.addf %6, %8 : vector<64x8xf32>
    %10 = vector.extract_strided_slice %9 {offsets = [0, 0], sizes = [32, 8], strides = [1, 1]} : vector<64x8xf32> to vector<32x8xf32>
    %11 = vector.shape_cast %10 : vector<32x8xf32> to vector<2x16x8xf32>
    %12 = vector.extract_strided_slice %9 {offsets = [32, 0], sizes = [32, 8], strides = [1, 1]} : vector<64x8xf32> to vector<32x8xf32>
    %13 = vector.shape_cast %12 : vector<32x8xf32> to vector<2x16x8xf32>
    %c0_7 = arith.constant 0 : index
    %c0_8 = arith.constant 0 : index
    %c0_9 = arith.constant 0 : index
    %14 = vector.load %arg12[%c0_7, %c0_8, %c0_9] : memref<2x16x8xf32, #tpu.memory_space<vmem>>, vector<2x16x8xf32>
    %cst_10 = arith.constant dense<0.000000e+00> : vector<2x8x8xf32>
    %15 = tpu.matmul %11, %14, %cst_10 {dimension_numbers = #tpu.dot_dimension_numbers<[1], [1], [2], [2], [0, 0, 0, 2, 1, 2], [0], [0]>} : vector<2x16x8xf32>, vector<2x16x8xf32>, vector<2x8x8xf32> -> vector<2x8x8xf32>
    %c0_11 = arith.constant 0 : index
    %c0_12 = arith.constant 0 : index
    %c0_13 = arith.constant 0 : index
    %16 = vector.load %arg13[%c0_11, %c0_12, %c0_13] : memref<2x1x8xf32, #tpu.memory_space<vmem>>, vector<2x1x8xf32>
    %cst_14 = arith.constant dense<0xFF800000> : vector<2x8xf32>
    %17 = vector.multi_reduction <maximumf>, %15, %cst_14 [1] : vector<2x8x8xf32> to vector<2x8xf32>
    %18 = vector.shape_cast %17 : vector<2x8xf32> to vector<2x1x8xf32>
    %19 = arith.maximumf %16, %18 : vector<2x1x8xf32>
    %20 = arith.subf %16, %19 : vector<2x1x8xf32>
    %21 = math.exp %20 : vector<2x1x8xf32>
    %22 = vector.broadcast %19 : vector<2x1x8xf32> to vector<2x8x8xf32>
    %23 = arith.subf %15, %22 : vector<2x8x8xf32>
    %24 = math.exp %23 : vector<2x8x8xf32>
    %cst_15 = arith.constant 1.000000e+00 : f32
    %25 = vector.broadcast %cst_15 : f32 to vector<2x1x8xf32>
    %cst_16 = arith.constant dense<0.000000e+00> : vector<2x1x8xf32>
    %26 = tpu.matmul %25, %24, %cst_16 {dimension_numbers = #tpu.dot_dimension_numbers<[2], [1], [1], [2], [0, 0, 0, 1, 1, 2], [0], [0]>} : vector<2x1x8xf32>, vector<2x8x8xf32>, vector<2x1x8xf32> -> vector<2x1x8xf32>
    %cst_17 = arith.constant dense<0.000000e+00> : vector<2x16x8xf32>
    %27 = tpu.matmul %13, %24, %cst_17 {dimension_numbers = #tpu.dot_dimension_numbers<[2], [1], [1], [2], [0, 0, 0, 1, 1, 2], [0], [0]>} : vector<2x16x8xf32>, vector<2x8x8xf32>, vector<2x16x8xf32> -> vector<2x16x8xf32>
    %c0_18 = arith.constant 0 : index
    %c0_19 = arith.constant 0 : index
    %c0_20 = arith.constant 0 : index
    %28 = vector.load %arg14[%c0_18, %c0_19, %c0_20] : memref<2x1x8xf32, #tpu.memory_space<vmem>>, vector<2x1x8xf32>
    %29 = arith.mulf %21, %28 : vector<2x1x8xf32>
    %30 = arith.addf %29, %26 : vector<2x1x8xf32>
    %c0_21 = arith.constant 0 : index
    %c0_22 = arith.constant 0 : index
    %c0_23 = arith.constant 0 : index
    %31 = vector.load %arg14[%c0_21, %c0_22, %c0_23] : memref<2x1x8xf32, #tpu.memory_space<vmem>>, vector<2x1x8xf32>
    tpu.vector_store %arg14[%c0_21, %c0_22, %c0_23], %30 {strides = array<i32>} : memref<2x1x8xf32, #tpu.memory_space<vmem>>, vector<2x1x8xf32>,
    %c0_24 = arith.constant 0 : index
    %c0_25 = arith.constant 0 : index
    %c0_26 = arith.constant 0 : index
    %32 = vector.load %arg15[%c0_24, %c0_25, %c0_26] : memref<2x16x8xf32, #tpu.memory_space<vmem>>, vector<2x16x8xf32>
    %33 = vector.broadcast %21 : vector<2x1x8xf32> to vector<2x16x8xf32>
    %34 = arith.mulf %33, %32 : vector<2x16x8xf32>
    %35 = arith.addf %34, %27 : vector<2x16x8xf32>
    %c0_27 = arith.constant 0 : index
    %c0_28 = arith.constant 0 : index
    %c0_29 = arith.constant 0 : index
    %36 = vector.load %arg15[%c0_27, %c0_28, %c0_29] : memref<2x16x8xf32, #tpu.memory_space<vmem>>, vector<2x16x8xf32>
    tpu.vector_store %arg15[%c0_27, %c0_28, %c0_29], %35 {strides = array<i32>} : memref<2x16x8xf32, #tpu.memory_space<vmem>>, vector<2x16x8xf32>,
    %c0_30 = arith.constant 0 : index
    %c0_31 = arith.constant 0 : index
    %c0_32 = arith.constant 0 : index
    %37 = vector.load %arg13[%c0_30, %c0_31, %c0_32] : memref<2x1x8xf32, #tpu.memory_space<vmem>>, vector<2x1x8xf32>
    tpu.vector_store %arg13[%c0_30, %c0_31, %c0_32], %19 {strides = array<i32>} : memref<2x1x8xf32, #tpu.memory_space<vmem>>, vector<2x1x8xf32>,
    %c0_i32_33 = arith.constant 0 : i32
    %38 = arith.cmpi eq, %arg2, %c0_i32_33 : i32
    %39 = arith.extui %38 : i1 to i32
    %c0_i32_34 = arith.constant 0 : i32
    %40 = arith.cmpi ne, %39, %c0_i32_34 : i32
    scf.if %40 {
      %c0_35 = arith.constant 0 : index
      %c0_36 = arith.constant 0 : index
      %c0_37 = arith.constant 0 : index
      %41 = vector.load %arg14[%c0_35, %c0_36, %c0_37] : memref<2x1x8xf32, #tpu.memory_space<vmem>>, vector<2x1x8xf32>
      %42 = tpu.reciprocal %41 : vector<2x1x8xf32> -> vector<2x1x8xf32>
      %c0_38 = arith.constant 0 : index
      %c0_39 = arith.constant 0 : index
      %c0_40 = arith.constant 0 : index
      %43 = vector.load %arg15[%c0_38, %c0_39, %c0_40] : memref<2x16x8xf32, #tpu.memory_space<vmem>>, vector<2x16x8xf32>
      %44 = vector.broadcast %42 : vector<2x1x8xf32> to vector<2x16x8xf32>
      %45 = arith.mulf %43, %44 : vector<2x16x8xf32>
      %46 = vector.shape_cast %45 : vector<2x16x8xf32> to vector<32x8xf32>
      %c0_41 = arith.constant 0 : index
      %c0_42 = arith.constant 0 : index
      %47 = vector.load %arg9[%c0_41, %c0_42] : memref<32x32xf32, #tpu.memory_space<vmem>>, vector<32x32xf32>
      %cst_43 = arith.constant dense<0.000000e+00> : vector<8x32xf32>
      %48 = tpu.matmul %46, %47, %cst_43 {dimension_numbers = #tpu.dot_dimension_numbers<[0], [0], [1], [1], [0, 1, 1, 1], [], []>} : vector<32x8xf32>, vector<32x32xf32>, vector<8x32xf32> -> vector<8x32xf32>
      %c0_44 = arith.constant 0 : index
      %c0_45 = arith.constant 0 : index
      %49 = vector.load %arg10[%c0_44, %c0_45] : memref<1x32xf32, #tpu.memory_space<vmem>>, vector<1x32xf32>
      %50 = vector.broadcast %49 : vector<1x32xf32> to vector<8x32xf32>
      %51 = arith.addf %48, %50 : vector<8x32xf32>
      %c0_46 = arith.constant 0 : index
      %c0_47 = arith.constant 0 : index
      %c0_48 = arith.constant 0 : index
      %52 = vector.load %arg11[%c0_46, %c0_47, %c0_48] : memref<1x8x32xf32, #tpu.memory_space<vmem>>, vector<1x8x32xf32>
      %53 = vector.shape_cast %52 : vector<1x8x32xf32> to vector<8x32xf32>
      %54 = vector.shape_cast %51 : vector<8x32xf32> to vector<1x8x32xf32>
      tpu.vector_store %arg11[%c0_46, %c0_47, %c0_48], %54 {strides = array<i32>} : memref<1x8x32xf32, #tpu.memory_space<vmem>>, vector<1x8x32xf32>,
    } else {
    }
    return
  }
  func.func @transform_0(%arg0: i32, %arg1: i32, %arg2: i32) -> (i32, i32, i32) {
    %c0_i32 = arith.constant 0 : i32
    %c0_i32_0 = arith.constant 0 : i32
    return %arg0, %c0_i32, %arg1 : i32, i32, i32
  }
  func.func @transform_1(%arg0: i32, %arg1: i32, %arg2: i32) -> (i32, i32, i32) {
    %c0_i32 = arith.constant 0 : i32
    %c0_i32_0 = arith.constant 0 : i32
    return %arg0, %c0_i32, %arg2 : i32, i32, i32
  }
  func.func @transform_2(%arg0: i32, %arg1: i32, %arg2: i32) -> (i32, i32) {
    %c0_i32 = arith.constant 0 : i32
    %c0_i32_0 = arith.constant 0 : i32
    %c0_i32_1 = arith.constant 0 : i32
    return %c0_i32, %c0_i32_0 : i32, i32
  }
  func.func @transform_3(%arg0: i32, %arg1: i32, %arg2: i32) -> (i32, i32) {
    %c0_i32 = arith.constant 0 : i32
    %c0_i32_0 = arith.constant 0 : i32
    %c0_i32_1 = arith.constant 0 : i32
    return %c0_i32, %c0_i32_0 : i32, i32
  }
  func.func @transform_4(%arg0: i32, %arg1: i32, %arg2: i32) -> (i32, i32) {
    %c0_i32 = arith.constant 0 : i32
    %c0_i32_0 = arith.constant 0 : i32
    %c0_i32_1 = arith.constant 0 : i32
    return %c0_i32, %c0_i32_0 : i32, i32
  }
  func.func @transform_5(%arg0: i32, %arg1: i32, %arg2: i32) -> (i32, i32) {
    %c0_i32 = arith.constant 0 : i32
    %c0_i32_0 = arith.constant 0 : i32
    %c0_i32_1 = arith.constant 0 : i32
    return %c0_i32, %c0_i32_0 : i32, i32
  }
  func.func @transform_6(%arg0: i32, %arg1: i32, %arg2: i32) -> (i32, i32) {
    %c0_i32 = arith.constant 0 : i32
    %c0_i32_0 = arith.constant 0 : i32
    %c0_i32_1 = arith.constant 0 : i32
    return %c0_i32, %c0_i32_0 : i32, i32
  }
  func.func @transform_7(%arg0: i32, %arg1: i32, %arg2: i32) -> (i32, i32) {
    %c0_i32 = arith.constant 0 : i32
    %c0_i32_0 = arith.constant 0 : i32
    %c0_i32_1 = arith.constant 0 : i32
    return %c0_i32, %c0_i32_0 : i32, i32
  }
  func.func @transform_8(%arg0: i32, %arg1: i32, %arg2: i32) -> (i32, i32, i32) {
    %c0_i32 = arith.constant 0 : i32
    %c0_i32_0 = arith.constant 0 : i32
    return %arg0, %arg1, %c0_i32 : i32, i32, i32
  }
}

</mosaic_0001>

<bundles_post_ra>
// kernel: tpu_custom_call.1
= control target key start
LH: loop header
LB: loop body
LE: loop exit
PB: predicated region body
PF: predicated region fallthrough
CT: control target
= control target key end

     0   :  { %13 = vsyncpa [#allocation8], 0  ;;  %s2237_s0 = inlined_call_operand.vmem [shape: f32[2,32,8], index: 0, kind: input, shape index: {}]   ;;  %s2238_s1 = inlined_call_operand.vmem [shape: f32[2,32,8], index: 1, kind: input, shape index: {}]   ;;  %s2239_s2 = inlined_call_operand.vmem [shape: f32[32,32], index: 2, kind: input, shape index: {}]   ;;  %s2240_s3 = inlined_call_operand.vmem [shape: f32[32,1], index: 3, kind: input, shape index: {}]   ;;  %s2241_s4 = inlined_call_operand.vmem [shape: f32[64,32], index: 4, kind: input, shape index: {}]   ;;  %s2242_s5 = inlined_call_operand.vmem [shape: f32[64,1], index: 5, kind: input, shape index: {}]   ;;  %s2243_s6 = inlined_call_operand.vmem [shape: f32[32,32], index: 6, kind: input, shape index: {}]   ;;  %s2244_s7 = inlined_call_operand.vmem [shape: f32[1,32], index: 7, kind: input, shape index: {}]   ;;  %s2245_s8 = inlined_call_operand.hbm [shape: f32[2,8,32], index: 8, kind: output, shape index: {}]  }
   0x1   :  { %15 = vsyncpa [#allocation8 + $0x1], 0  ;;  %s1954_s27 = smov 0   ;;  %s1956_s28 = smov 0  }
   0x2   :  { %s1958_s29 = smov 0   ;;  %s1960_s30 = smov 0  }
   0x3   :  { %s1962_s9 = smov 0   ;;  %s1964_s10 = smov 0  }
   0x4 LB: > { %2248 = sst [smem:[#allocation10_spill]] %s1896_s9  ;;  %s1561_s11 = sadd.s32 4294967295, %s1900_s10   ;;  %s1900_s10 = sphi %s1964_s10, %s21_s10   ;;  %s1896_s9 = sphi %s1962_s9, %s2253_s9   ;;  %s1892_s30 = sphi %s1960_s30, %s2252_s30   ;;  %s1888_s29 = sphi %s1958_s29, %s2256_s29   ;;  %s1884_s28 = sphi %s1956_s28, %s2255_s28   ;;  %s1880_s27 = sphi %s1954_s27, %s2254_s27  }
   0x5   : > { %s1562_s12 = sadd.s32 4294967294, %s1900_s10   ;;  %s40_s13 = sadd.s32 1, %s1896_s9 }
   0x6   : > { %s231_s14 = sadd.s32 1, %s1888_s29  ;;  %p42_p0 = scmp.ge.s32.totalorder %s40_s13, 2 }
   0x7   : > { %p241_p1 = scmp.ne.s32.totalorder %s1888_s29, %s1884_s28  ;;  %p242_p2 = scmp.eq.s32.totalorder %s1561_s11, 1 }
   0x8   : > { %p247_p3 = scmp.ne.s32.totalorder %s1884_s28, %s1880_s27  ;;  %s2258_s13 = smov (%p42_p0, %s40_s13), 0 }
   0x9   : > { %2249 = sst [smem:[#allocation11_spill]] %s2258_s13  ;;  %p1994_p4 = por %p242_p2, %p241_p1 }
   0xa   : > { %p248_p5 = scmp.eq.s32.totalorder %s1562_s12, 1  ;;  %s226_s16 = ssub.s32 %s1896_s9, %s2258_s13 }
   0xb   : > { %p1565_p6 = scmp.ge.s32.totalorder %s1900_s10, 1  ;;  %p229_p7 = scmp.eq.s32.totalorder %s226_s16, 0 }
   0xc   : > { %p2001_p8 = por %p248_p5, %p247_p3  ;;  %p306_p9 = scmp.lt.s32.totalorder %s1900_s10, 3 }
   0xd   : > { %s2007_s18 = scalar_select %p229_p7, %s1888_s29, %s231_s14  }
   0xe   : > { %p307_p10 = pnand %p1565_p6, %p306_p9 }
   0xf   : > { %p351_p11 = scmp.lt.s32.totalorder (!%p307_p10), %s1892_s30, 1  ;;  %v371_v0 = vld [vmem:[%s2239_s2] sm:$0xff] (!%p307_p10)  ;;  %vm403_vm0 = vcmask (!%p307_p10), 261120   ;;  %v1902_v2 = vmov (!%p307_p10), 0   ;;  %v529_v4 = vld [vmem:[%s2242_s5 + $0x10] sm:$0xff] (!%p307_p10)  ;;  %v528_v5 = vld [vmem:[%s2242_s5 + $0x8] sm:$0xff] (!%p307_p10) }
  0x10   : > { %310 = sbr.rel (%p307_p10) target bundleno = 1222 (0x4c6), region = 52  ;;  %v515_v1 = vld [vmem:[%s2241_s4] sm:$0xff] (!%p307_p10)  ;;  %1648 = vmatprep.mubr.msk.f32.mxu0 (!%p307_p10), %vm403_vm0, %v371_v0  ;;  %1808 = vset.pattern.permute.xlu0 (!%p307_p10), %v1902_v2  ;;  %v530_v6 = vld [vmem:[%s2242_s5 + $0x18] sm:$0xff] (!%p307_p10)  ;;  %v380_v20 = vld [vmem:[%s2240_s3 + $0x8] sm:$0xff] (!%p307_p10)  ;;  %v1903_v33 = vmov (!%p307_p10), 0.0|0.0   ;;  %vm501_vm1 = vcmask (!%p307_p10), 64512  }
  0x11   : > { %1662 = vmatprep.mubr.msk.f32.mxu1 (!%p307_p10), %vm403_vm0, %v515_v1  ;;  %v527_v3 = vld [vmem:[%s2242_s5] sm:$0xff] (!%p307_p10)  ;;  %1809 = vset.pattern.permute.xlu1 (!%p307_p10), %v1902_v2  ;;  %v381_v21 = vld [vmem:[%s2240_s3 + $0x10] sm:$0xff] (!%p307_p10)  ;;  %v372_v22 = vld [vmem:[%s2239_s2 + $0x8] sm:$0xff] (!%p307_p10)  ;;  %vm1904_vm2 = vmmov (!%p307_p10), 0   ;;  %v1905_v34 = vmov (!%p307_p10), 0.0   ;;  %vm506_vm3 = vcmask (!%p307_p10), 57344  }
  0x12   : > { %537 = vperm.xlu0 (!%p307_p10), %1808, %v527_v3   ;;  %547 = vperm.xlu1 (!%p307_p10), %1809, %v529_v4   ;;  %v379_v19 = vld [vmem:[%s2240_s3] sm:$0xff] (!%p307_p10)  ;;  %v382_v23 = vld [vmem:[%s2240_s3 + $0x18] sm:$0xff] (!%p307_p10)  ;;  %v516_v24 = vld [vmem:[%s2241_s4 + $0x8] sm:$0xff] (!%p307_p10)  ;;  %511 = vst.msk [vmem:[#allocation5] sm:$0xff] (!%p307_p10), %vm501_vm1, %v1905_v34  ;;  %vm741_vm4 = vcmask (!%p307_p10), 130048   ;;  %s348_s9 = sand.u32 (!%p307_p10), 1, %s1884_s28  }
  0x13   : > { %v373_v25 = vld [vmem:[%s2239_s2 + $0x10] sm:$0xff] (!%p307_p10)  ;;  %v374_v27 = vld [vmem:[%s2239_s2 + $0x18] sm:$0xff] (!%p307_p10)  ;;  %v519_v29 = vld [vmem:[%s2241_s4 + $0x20] sm:$0xff] (!%p307_p10)  ;;  %512 = vst.msk [vmem:[#allocation5 + $0x8] sm:$0xff] (!%p307_p10), %vm501_vm1, %v1905_v34  ;;  %s1566_s26 = sshll.u32 (!%p307_p10), %s348_s9, 3  ;;  %s1594_s14 = sshll.u32 (!%p307_p10), %s1892_s30, 7 }
  0x14   : > { %v517_v26 = vld [vmem:[%s2241_s4 + $0x10] sm:$0xff] (!%p307_p10)  ;;  %v518_v28 = vld [vmem:[%s2241_s4 + $0x18] sm:$0xff] (!%p307_p10)  ;;  %v520_v30 = vld [vmem:[%s2241_s4 + $0x28] sm:$0xff] (!%p307_p10)  ;;  %513 = vst.msk [vmem:[#allocation5 + $0x10] sm:$0xff] (!%p307_p10), %vm501_vm1, %v1905_v34  ;;  %s350_s16 = scalar_lea.vmem (!%p307_p10), [#allocation7], %s1566_s26  ;;  %s2189_s22 = scalar_lea.hbm (!%p307_p10), %s2245_s8, %s1594_s14 }
  0x15   : > { %v521_v31 = vld [vmem:[%s2241_s4 + $0x30] sm:$0xff] (!%p307_p10)  ;;  %v522_v32 = vld [vmem:[%s2241_s4 + $0x38] sm:$0xff] (!%p307_p10)  ;;  %514 = vst.msk [vmem:[#allocation5 + $0x18] sm:$0xff] (!%p307_p10), %vm501_vm1, %v1905_v34  ;;  %v532_v2 = vld [vmem:[%s2242_s5 + $0x28] sm:$0xff] (!%p307_p10)  ;;  %s1466_s19 = sshll.u32 (!%p307_p10), %s350_s16, 4  ;;  %s2191_s19 = int_to_ptr.vmem [resolvable:$true] %s1466_s19 }
  0x16   : > { %542 = vperm.xlu0 (!%p307_p10), %1808, %v528_v5   ;;  %552 = vperm.xlu1 (!%p307_p10), %1809, %v530_v6   ;;  %v534_v4 = vld [vmem:[%s2242_s5 + $0x38] sm:$0xff] (!%p307_p10)  ;;  %v531_v6 = vld [vmem:[%s2242_s5 + $0x20] sm:$0xff] (!%p307_p10)  ;;  %509 = vst.msk [vmem:[#allocation4] sm:$0x1] (!%p307_p10), %vm506_vm3, %v1905_v34  ;;  %510 = vst.msk [vmem:[#allocation4 + $0x1] sm:$0x1] (!%p307_p10), %vm506_vm3, %v1905_v34 }
  0x17   : > { %s352_s23 = scalar_select %p351_p11, %s1892_s30, 1 }
  0x18   : > { %s1822_s25 = scalar_lea.vmem %s2191_s19, 128  ;;  %s1908_s30 = smov [#allocation7]  }
  0x19   : > { %s1597_s12 = sshll.u32 %s352_s23, 5  ;;  %p1823_p12 = scmp.ne.s32.totalorder %s2191_s19, %s1822_s25 }
  0x1a   : > { %s358_s21 = scalar_lea.vmem %s2237_s0, %s1597_s12  ;;  %s366_s24 = scalar_lea.vmem %s2238_s1, %s1597_s12  ;;  %385 = vperm.xlu0 %1808, %v379_v19   ;;  %390 = vperm.xlu1 %1809, %v380_v20  }
  0x1b   : > { %v375_v7 = vld [vmem:[%s358_s21] sm:$0xff]  ;;  %v376_v8 = vld [vmem:[%s358_s21 + $0x8] sm:$0xff]  ;;  %v377_v12 = vld [vmem:[%s358_s21 + $0x10] sm:$0xff]  ;;  %p1824_p13 = pnand %p1823_p12, %p1994_p4  ;;  %s1826_s13 = sshll.u32 %s1908_s30, 4  ;;  %s1827_s13 = int_to_ptr.vmem [resolvable:$false] %s1826_s13 }
  0x1c   : > { %v523_v9 = vld [vmem:[%s366_s24] sm:$0xff]  ;;  %v1719_v10 = vpack.c.bf16 %v376_v8, %v375_v7  ;;  %v524_v11 = vld [vmem:[%s366_s24 + $0x8] sm:$0xff]  ;;  %v378_v13 = vld [vmem:[%s358_s21 + $0x18] sm:$0xff]  ;;  %s1828_s23 = scalar_lea.vmem %s1827_s13, 256  ;;  %p1829_p1 = scmp.lt.s32.totalorder %s2191_s19, %s1827_s13 }
  0x1d   : > { %v1727_v14 = vpack.c.bf16 %v524_v11, %v523_v9  ;;  %v1723_v15 = vpack.c.bf16 %v378_v13, %v377_v12  ;;  %v525_v16 = vld [vmem:[%s366_s24 + $0x10] sm:$0xff]  ;;  %v526_v17 = vld [vmem:[%s366_s24 + $0x18] sm:$0xff]  ;;  %v1906_v9 = vmov -inf   ;;  %s1452_s24 = scalar_lea.sflag [#allocation8], %s348_s9  ;;  %p1825_p0 = pneg %p1824_p13 }
  0x1e   : > { %1720 = vmatprep.subr.bf16.mxu0 %v1719_v10  ;;  %v1731_v18 = vpack.c.bf16 %v526_v17, %v525_v16  ;;  %395 = vperm.xlu0 %1808, %v381_v21   ;;  %v533_v8 = vld [vmem:[%s2242_s5 + $0x30] sm:$0xff]  ;;  %507 = vst.msk [vmem:[#allocation3] sm:$0x1] %vm506_vm3, %v1906_v9  ;;  %508 = vst.msk [vmem:[#allocation3 + $0x1] sm:$0x1] %vm506_vm3, %v1906_v9  ;;  %v947_v17 = vlaneseq  ;;  %p1830_p2 = scmp.lt.s32.totalorder %s1828_s23, %s1822_s25 }
  0x1f   : > { %1728 = vmatprep.subr.bf16.mxu1 %v1727_v14  ;;  %1722 = vmatpush3.bf16.msra.mxu0 %v1719_v10 }
  0x20   : > { %1730 = vmatpush3.bf16.msra.mxu1 %v1727_v14  ;;  %1724 = vmatprep.subr.bf16.mxu0 %v1723_v15  ;;  %p1831_p3 = por %p1830_p2, %p1829_p1 }
  0x21   : > { %1732 = vmatprep.subr.bf16.mxu1 %v1731_v18  ;;  %400 = vperm.xlu1 %1809, %v382_v23  }
  0x22   : > { %p1832_p5 = pnand %p1831_p3, %p1825_p0 }
  0x23   : > { %1726 = vmatpush3.bf16.msra.mxu0 %v1723_v15 }
  0x24   : > { %1734 = vmatpush3.bf16.msra.mxu1 %v1731_v18  ;;  %1738 = vmatprep.subr.bf16.mxu0 %v1903_v33 }
  0x25   : > { %1735 = vmatprep.subr.bf16.mxu1 %v1903_v33 }
  0x26   : > { %1649 = vmatmul.mubr.msk.f32.vlgmr.msra.gmra.mrb[0].mxu0 %vm403_vm0, %v372_v22 }
  0x27   : > { %1663 = vmatmul.mubr.msk.f32.vlgmr.msra.gmra.mrb[0].mxu1 %vm403_vm0, %v516_v24  ;;  %1651 = vmatprep.mubr.msk.f32.mxu0 %vm403_vm0, %v373_v25  ;;  %v948_v24 = vshrl.u32 %v947_v17, 7  ;;  %v1280_v17 = vld [vmem:[#allocation5 + $0x18] sm:$0xff] }
  0x28   : > { %1665 = vmatprep.mubr.msk.f32.mxu1 %vm403_vm0, %v517_v26 }
  0x2a   : > { %1652 = vmatmul.mubr.msk.f32.gmra.mrb[2].mxu0 %vm403_vm0, %v374_v27 }
  0x2b   : > { %1666 = vmatmul.mubr.msk.f32.gmra.mrb[2].mxu1 %vm403_vm0, %v518_v28  ;;  %1685 = vmatprep.mubr.msk.f32.mxu0 %vm1904_vm2, %v1905_v34  ;;  %v920_v28 = vld [vmem:[#allocation3] sm:$0x1] }
  0x2c   : > { %1668 = vmatprep.mubr.msk.f32.mxu1 %vm403_vm0, %v519_v29 }
  0x2f   : > { %1669 = vmatmul.mubr.msk.f32.gmra.mrb[4].mxu1 %vm403_vm0, %v520_v30  ;;  %v2139_v30 = vsub.s32 0, %v948_v24 }
  0x30   : > { %1671 = vmatprep.mubr.msk.f32.mxu1 %vm403_vm0, %v521_v31 }
  0x33   : > { %1672 = vmatmul.mubr.msk.f32.gmra.mrb[6].mxu1 %vm403_vm0, %v522_v32 }
  0x34   : > { %1678 = vmatprep.mubr.msk.f32.mxu1 %vm1904_vm2, %v1905_v34 }
  0x91   : > { %v548_v35 = vpop.permute.xlu1 %547  ;;  %v538_v36 = vpop.permute.xlu0 %537 }
  0x95   : > { %v553_v37 = vpop.permute.xlu1 %552  ;;  %v543_v38 = vpop.permute.xlu0 %542 }
  0x99   : > { %v391_v39 = vpop.permute.xlu1 %390  ;;  %v386_v40 = vpop.permute.xlu0 %385 }
  0x9d   : > { %v396_v49 = vpop.permute.xlu0 %395 }
  0xa0   : > { %v401_v47 = vpop.permute.xlu1 %400 }
  0xf9   : > { %v1650_v41 = vpop.f32.mrb[0].mxu0 }
  0xfa   : > { %v1664_v42 = vpop.f32.mrb[0].mxu1  ;;  %v488_v43 = vadd.f32 %v1650_v41, %v391_v39  ;;  %v482_v44 = vpop.f32.mrb[1].mxu0 }
  0xfb   : > { %v483_v45 = vadd.f32 %v482_v44, %v386_v40  ;;  %v666_v46 = vpop.f32.mrb[1].mxu1  ;;  %v672_v56 = vadd.f32 %v1664_v42, %v543_v38 }
  0xfc   : > { %503 = vst.msk [vmem:[#allocation2 + $0x8] sm:$0xff] %vm501_vm1, %v488_v43  ;;  %v667_v48 = vadd.f32 %v666_v46, %v538_v36  ;;  %v921_v36 = vld [vmem:[#allocation3 + $0x1] sm:$0x1] }
  0xfd   : > { %502 = vst.msk [vmem:[#allocation2] sm:$0xff] %vm501_vm1, %v483_v45  ;;  %v1653_v50 = vpop.f32.mrb[2].mxu0 }
  0xfe   : > { %v1667_v51 = vpop.f32.mrb[2].mxu1  ;;  %709 = vxpose.xlu0.b32.start [1/2] (short) (narrow) %v667_v48, 8  ;;  %v498_v52 = vadd.f32 %v1653_v50, %v401_v47  ;;  %v492_v53 = vpop.f32.mrb[3].mxu0 }
  0xff   : > { %v493_v54 = vadd.f32 %v492_v53, %v396_v49  ;;  %v676_v55 = vpop.f32.mrb[3].mxu1  ;;  %v682_v58 = vadd.f32 %v1667_v51, %v553_v37 }
 0x100   : > { %505 = vst.msk [vmem:[#allocation2 + $0x18] sm:$0xff] %vm501_vm1, %v498_v52  ;;  %v677_v57 = vadd.f32 %v676_v55, %v548_v35  ;;  %v1907_v52 = vmov 1.0  }
 0x101   : > { %504 = vst.msk [vmem:[#allocation2 + $0x10] sm:$0xff] %vm501_vm1, %v493_v54 }
 0x102   : > { %815 = vxpose.xlu1.b32.start [1/2] (short) (narrow) %v677_v57, 8  ;;  %710 = vxpose.xlu0.b32.end [2/2] (short) (narrow) %v672_v56, 8  ;;  %v2107_v60 = vpop.f32.mrb[4].mxu1 }
 0x103   : > { %v706_v59 = vld [vmem:[#allocation2 + $0x8] sm:$0xff]  ;;  %v686_v3 = vpop.f32.mrb[5].mxu1 }
 0x104   : > { %v705_v61 = vld [vmem:[#allocation2] sm:$0xff] }
 0x105   : > { %v1736_v62 = vpack.c.bf16 %v706_v59, %v705_v61  ;;  %v1335_v59 = vld [vmem:[%s2243_s6 + $0x8] sm:$0xff] }
 0x106   : > { %816 = vxpose.xlu1.b32.end [2/2] (short) (narrow) %v682_v58, 8  ;;  %v2117_v5 = vpop.f32.mrb[6].mxu1  ;;  %v1334_v58 = vld [vmem:[%s2243_s6] sm:$0xff] }
 0x107   : > { %1737 = vmatpush3.bf16.msra.mxu1 %v1736_v62  ;;  %v708_v63 = vld [vmem:[#allocation2 + $0x18] sm:$0xff]  ;;  %v2122_v7 = vpop.f32.mrb[7].mxu1  ;;  %v1742_v61 = vpack.c.bf16 %v1335_v59, %v1334_v58 }
 0x108   : > { %v707_v0 = vld [vmem:[#allocation2 + $0x10] sm:$0xff]  ;;  %1693 = vmatprep.subr.mxu1 %v1905_v34  ;;  %v1337_v62 = vld [vmem:[%s2243_s6 + $0x18] sm:$0xff] }
 0x109   : > { %v1739_v1 = vpack.c.bf16 %v708_v63, %v707_v0 }
 0x10b   : > { %1740 = vmatpush3.bf16.msra.mxu0 %v1739_v1 }
 0x10c   : > { %1688 = vmatprep.subr.mxu0 %v1905_v34 }
 0x124   : > { %562 = vperm.xlu1 %1809, %v532_v2   ;;  %v1268_v2 = vld [vmem:[#allocation4] sm:$0x1] }
 0x128   : > { %572 = vperm.xlu1 %1809, %v534_v4  }
 0x12b   : > { %557 = vperm.xlu0 %1808, %v531_v6  }
 0x12f   : > { %567 = vperm.xlu0 %1808, %v533_v8   ;;  %v1278_v8 = vld [vmem:[#allocation5 + $0x8] sm:$0xff] }
 0x17e   : > { %v725_v10 = vpop.trf.xlu0 }
 0x17f   : > { %1679 = vmatmul.mubr.msk.f32.vlgmr.msra.gmra.mrb[8].mxu1 %vm741_vm4, %v725_v10 }
 0x180   : > { %1695 = vmatprep.mubr.msk.f32.mxu1 %vm1904_vm2, %v1905_v34 }
 0x182   : > { %v831_v11 = vpop.trf.xlu1 }
 0x183   : > { %1686 = vmatmul.mubr.msk.f32.vlgmr.msra.gmra.mrb[4].mxu0 %vm741_vm4, %v831_v11  ;;  %v1277_v11 = vld [vmem:[#allocation5] sm:$0xff] }
 0x184   : > { %1690 = vmatprep.mubr.msk.f32.mxu0 %vm1904_vm2, %v1905_v34 }
 0x1a3   : > { %v563_v48 = vpop.permute.xlu1 %562 }
 0x1a4   : > { %v692_v54 = vadd.f32 %v2107_v60, %v563_v48  ;;  %v1336_v60 = vld [vmem:[%s2243_s6 + $0x10] sm:$0xff]  ;;  %v1591_v48 = vld [vmem:[%s2244_s7] ss:$0 sm:$0xff] }
 0x1a7   : > { %v573_v55 = vpop.permute.xlu1 %572 }
 0x1a8   : > { %v702_v57 = vadd.f32 %v2117_v5, %v573_v55 }
 0x1aa   : > { %v558_v47 = vpop.permute.xlu0 %557 }
 0x1ab   : > { %v687_v50 = vadd.f32 %v686_v3, %v558_v47 }
 0x1ae   : > { %v568_v51 = vpop.permute.xlu0 %567 }
 0x1af   : > { %v697_v56 = vadd.f32 %v2122_v7, %v568_v51  ;;  %v1269_v7 = vld [vmem:[#allocation4 + $0x1] sm:$0x1] }
 0x252   : > { %v811_v12 = vpop.f32.mrb[8].mxu1 }
 0x253   : > { %v923_v13 = vsel %vm501_vm1, %v811_v12, -inf  ;;  %v1680_v14 = vpop.f32.mrb[9].mxu1 }
 0x254   : > { %v924_v15 = vrot.slane %v923_v13, 4 }
 0x256   : > { %v925_v16 = vmax.f32 %v923_v13, %v924_v15  ;;  %v916_v18 = vpop.f32.mrb[4].mxu0 }
 0x257   : > { %v930_v19 = vsel %vm501_vm1, %v916_v18, -inf  ;;  %v1687_v20 = vpop.f32.mrb[5].mxu0 }
 0x258   : > { %v926_v21 = vrot.slane %v925_v16, 2  ;;  %v931_v22 = vrot.slane %v930_v19, 4 }
 0x25a   : > { %v927_v23 = vmax.f32 %v925_v16, %v926_v21  ;;  %v932_v25 = vmax.f32 %v930_v19, %v931_v22  ;;  %v1279_v22 = vld [vmem:[#allocation5 + $0x10] sm:$0xff] }
 0x25c   : > { %v928_v26 = vrot.slane %v927_v23, 1  ;;  %v933_v27 = vrot.slane %v932_v25, 2 }
 0x25e   : > { %v929_v29 = vmax.f32 %v927_v23, %v928_v26  ;;  %v934_v31 = vmax.f32 %v932_v25, %v933_v27 }
 0x260   : > { %v937_v32 = vmax.f32 %v920_v28, %v929_v29  ;;  %v935_v35 = vrot.slane %v934_v31, 1 }
 0x262   : > { %v939_v37 = vsub.f32 %v920_v28, %v937_v32  ;;  %v950_v38 = vrot.slane %v937_v32, %v2139_v30  ;;  %1305 = vst.msk [vmem:[#allocation3] sm:$0x1] %vm506_vm3, %v937_v32  ;;  %v936_v39 = vmax.f32 %v934_v31, %v935_v35 }
 0x264   : > { %v957_v40 = vsub.f32 %v811_v12, %v950_v38  ;;  %v938_v41 = vmax.f32 %v921_v36, %v936_v39  ;;  %v941_v63 = vmul.f32 1.442695, %v939_v37 }
 0x266   : > { %v959_v42 = vmul.f32 1.442695, %v957_v40  ;;  %v940_v43 = vsub.f32 %v921_v36, %v938_v41  ;;  %v954_v44 = vrot.slane %v938_v41, %v2139_v30  ;;  %1306 = vst.msk [vmem:[#allocation3 + $0x1] sm:$0x1] %vm506_vm3, %v938_v41 }
 0x268   : > { %1810 = vpow2.f32 %v959_v42  ;;  %v958_v45 = vsub.f32 %v916_v18, %v954_v44  ;;  %v943_v0 = vmul.f32 1.442695, %v940_v43 }
 0x26a   : > { %v961_v46 = vmul.f32 1.442695, %v958_v45 }
 0x26c   : > { %1812 = vpow2.f32 %v961_v46 }
 0x26d   : > { %1814 = vpow2.f32 %v941_v63 }
 0x26e   : > { %1816 = vpow2.f32 %v943_v0 }
 0x272   : > { %v1811_v49 = vpop.eup %1810 }
 0x273   : > { %1689 = vmatpush3.msra.mxu0 %v1811_v49 }
 0x274   : > { %1691 = vmatmul.mubr.msk.f32.vlgmr.msra.gmra.mrb[6].mxu0 %vm501_vm1, %v1907_v52  ;;  %1698 = vmatprep.subr.mxu0 %v1811_v49 }
 0x275   : > { %1699 = vmatpush3.msra.mxu0 %v1811_v49  ;;  %1700 = vmatprep.mubr.msk.f32.mxu0 %vm501_vm1, %v687_v50 }
 0x276   : > { %v1813_v53 = vpop.eup %1812  ;;  %1741 = vmatprep.subr.bf16.mxu0 %v1903_v33 }
 0x277   : > { %1694 = vmatpush3.msra.mxu1 %v1813_v53  ;;  %v1815_v1 = vpop.eup %1814 }
 0x278   : > { %1696 = vmatmul.mubr.msk.f32.vlgmr.msra.gmra.mrb[10].mxu1 %vm501_vm1, %v1907_v52  ;;  %1701 = vmatmul.mubr.msk.f32.vlgmr.msra.gmra.mrb[8].mxu0 %vm501_vm1, %v692_v54  ;;  %v1270_v3 = vmul.f32 %v1815_v1, %v1268_v2  ;;  %v1286_v4 = vrot.slane %v1815_v1, %v2139_v30  ;;  %v1817_v5 = vpop.eup %1816 }
 0x279   : > { %1703 = vmatprep.subr.mxu1 %v1813_v53  ;;  %1705 = vmatprep.mubr.msk.f32.mxu1 %vm501_vm1, %v697_v56  ;;  %v1290_v13 = vrot.slane %v1817_v5, %v2139_v30 }
 0x27a   : > { %1704 = vmatpush3.msra.mxu1 %v1813_v53  ;;  %1716 = vmatprep.mubr.msk.f32.mxu0 %vm1904_vm2, %v1905_v34  ;;  %v1745_v34 = vpack.c.bf16 %v1337_v62, %v1336_v60  ;;  %v1294_v12 = vmul.f32 %v1286_v4, %v1278_v8  ;;  %v1293_v16 = vmul.f32 %v1286_v4, %v1277_v11 }
 0x27b   : > { %1743 = vmatpush3.bf16.msra.mxu0 %v1742_v61  ;;  %v1296_v24 = vmul.f32 %v1290_v13, %v1280_v17  ;;  %v1295_v26 = vmul.f32 %v1290_v13, %v1279_v22 }
 0x27c   : > { %1706 = vmatmul.mubr.msk.f32.vlgmr.msra.gmra.mrb[12].mxu1 %vm501_vm1, %v702_v57  ;;  %1744 = vmatprep.subr.bf16.mxu0 %v1903_v33  ;;  %v1271_v33 = vmul.f32 %v1817_v5, %v1269_v7 }
 0x27f   : > { %1746 = vmatpush3.bf16.msra.mxu0 %v1745_v34 }
 0x347   : > { %v1032_v6 = vpop.f32.mrb[6].mxu0 }
 0x348   : > { %v1272_v9 = vadd.f32 %v1270_v3, %v1032_v6  ;;  %v1692_v10 = vpop.f32.mrb[7].mxu0 }
 0x34a   : > { %1275 = vst.msk [vmem:[#allocation4] sm:$0x1] %vm506_vm3, %v1272_v9 }
 0x34b   : > { %v1102_v14 = vpop.f32.mrb[10].mxu1  ;;  %v1702_v15 = vpop.f32.mrb[8].mxu0 }
 0x34c   : > { %v1273_v18 = vadd.f32 %v1271_v33, %v1102_v14  ;;  %v1298_v19 = vadd.f32 %v1702_v15, %v1294_v12  ;;  %v1178_v20 = vpop.f32.mrb[9].mxu0  ;;  %v1697_v21 = vpop.f32.mrb[11].mxu1 }
 0x34d   : > { %v1297_v23 = vadd.f32 %v1293_v16, %v1178_v20 }
 0x34e   : > { %1276 = vst.msk [vmem:[#allocation4 + $0x1] sm:$0x1] %vm506_vm3, %v1273_v18 }
 0x34f   : > { %1302 = vst.msk [vmem:[#allocation5 + $0x8] sm:$0xff] %vm501_vm1, %v1298_v19  ;;  %1301 = vst.msk [vmem:[#allocation5] sm:$0xff] %vm501_vm1, %v1297_v23  ;;  %v1707_v25 = vpop.f32.mrb[12].mxu1 }
 0x350   : > { %v1300_v27 = vadd.f32 %v1707_v25, %v1296_v24  ;;  %v1259_v28 = vpop.f32.mrb[13].mxu1 }
 0x351   : > { %v1299_v29 = vadd.f32 %v1295_v26, %v1259_v28  ;;  %v1310_v31 = vld [vmem:[#allocation4] sm:$0x1] }
 0x352   : > { %1304 = vst.msk [vmem:[#allocation5 + $0x18] sm:$0xff] %vm501_vm1, %v1300_v27  ;;  %1818 = vrcp.f32 %v1310_v31 }
 0x353   : > { %1303 = vst.msk [vmem:[#allocation5 + $0x10] sm:$0xff] %vm501_vm1, %v1299_v29 }
 0x355   : > { %v1311_v32 = vld [vmem:[#allocation4 + $0x1] sm:$0x1] }
 0x356   : > { %1820 = vrcp.f32 %v1311_v32  ;;  %v1314_v37 = vld [vmem:[#allocation5] sm:$0xff]  ;;  %v1315_v40 = vld [vmem:[#allocation5 + $0x8] sm:$0xff] }
 0x359   : > { %v1317_v45 = vld [vmem:[#allocation5 + $0x18] sm:$0xff] }
 0x35a   : > { %v1316_v43 = vld [vmem:[#allocation5 + $0x10] sm:$0xff] }
 0x35c   : > { %v1819_v35 = vpop.eup %1818 }
 0x35d   : > { %v1323_v36 = vrot.slane %v1819_v35, %v2139_v30 }
 0x35f   : > { %v1330_v38 = vmul.f32 %v1323_v36, %v1314_v37  ;;  %v1331_v41 = vmul.f32 %v1323_v36, %v1315_v40 }
 0x360   : > { %v1821_v39 = vpop.eup %1820 }
 0x361   : > { %1345 = vxpose.xlu0.b32.start [1/4] (short) (narrow) %v1330_v38, 8  ;;  %v1327_v42 = vrot.slane %v1821_v39, %v2139_v30 }
 0x363   : > { %v1332_v44 = vmul.f32 %v1327_v42, %v1316_v43  ;;  %v1333_v46 = vmul.f32 %v1327_v42, %v1317_v45 }
 0x365   : > { %1346 = vxpose.xlu0.b32.cont [2/4] (short) (narrow) %v1331_v41, 8 }
 0x369   : > { %1347 = vxpose.xlu0.b32.cont [3/4] (short) (narrow) %v1332_v44, 8 }
 0x36d   : > { %1348 = vxpose.xlu0.b32.end [4/4] (short) (narrow) %v1333_v46, 8 }
 0x3e1   : > { %v1361_v47 = vpop.trf.xlu0 }
 0x3e2   : > { %1717 = vmatmul.mubr.msk.f32.vlgmr.msra.gmra.mrb[10].mxu0 %vm403_vm0, %v1361_v47 }
 0x4b5   : > { %v1446_v30 = vpop.f32.mrb[10].mxu0 }
 0x4b6   : > { %v1447_v49 = vadd.f32 %v1591_v48, %v1446_v30  ;;  %v1718_v50 = vpop.f32.mrb[11].mxu0 }
 0x4b8   : > { %1450 = vst.msk [vmem:[%s350_s16] sm:$0xff] %vm403_vm0, %v1447_v49 }
 0x4b9   : > { %1835 = shalt.err (!%p1832_p5)
}
 0x4ba   : > { %s1836_s9 = scalar_lea.hbm %s2189_s22, 128  ;;  %s1840_s12 = scalar_lea.hbm %s2245_s8, 256 }
 0x4bb   : > { %p1837_p6 = scmp.ne.s32.totalorder %s2189_s22, %s1836_s9  ;;  %p1841_p10 = scmp.lt.u32.totalorder %s2189_s22, %s2245_s8 }
 0x4bc   : > { %p1842_p11 = scmp.lt.u32.totalorder %s1840_s12, %s1836_s9  ;;  %p1844_p13 = scmp.lt.u32.totalorder %s1836_s9, %s2189_s22 }
 0x4bd   : > { %p1838_p7 = pnand %p1837_p6, %p1994_p4 }
 0x4be   : > { %p1843_p12 = por %p1842_p11, %p1841_p10 }
 0x4bf   : > { %p1839_p9 = pneg %p1838_p7 }
 0x4c0   : > { %p1845_p0 = por %p1844_p13, %p1843_p12 }
 0x4c2   : > { %p1846_p1 = pnand %p1845_p0, %p1839_p9 }
 0x4c4   : > { %1849 = shalt.err (!%p1846_p1)
}
 0x4c5   : > { %1747 = dma.vmem_to_hbm [thread:$0]  (%p1994_p4), %s2191_s19, 128, %s2189_s22, %s1452_s24  }
 0x4c6 PF: > { %p1753_p2 = scmp.ge.s32.totalorder %s1900_s10, 2  ;;  %s1478_s20 = sand.u32 1, %s1880_s27  }
 0x4c7   : > { %s1479_s21 = scalar_lea.sflag [#allocation8], %s1478_s20 }
 0x4c8   : > { %p1750_p3 = pnand %p1753_p2, %p2001_p8 }
 0x4ca   : > { %1875 = dma.done.wait (!%p1750_p3), %s1479_s21, 128  }
 0x4cb   : > { %1877 = vsyncadd (!%p1750_p3), %s1479_s21, 4294967168  ;;  %s21_s10 = sadd.s32 1, %s1900_s10   ;;  %s2252_s30 = sld [smem:[#allocation10_spill]] }
 0x4cc   : > { %p18_p5 = scmp.ge.s32.totalorder %s21_s10, 4   ;;  %s2253_s9 = sld [smem:[#allocation11_spill]] }
 0x4cd   : > { %s2254_s27 = smov %s1884_s28  ;;  %s2255_s28 = smov %s1888_s29 }
 0x4ce   : > { %s2256_s29 = smov %s2007_s18  ;;  %20 = sbr.rel (!%p18_p5) target bundleno = 4 (0x4), region = 98 }
 0x4d5   :  { %1484 = vsyncpa [#allocation8], 1 }
 0x4d6   :  { %1486 = vsyncpa [#allocation8 + $0x1], 1 }

// kernel: tpu_custom_call.1
= control target key start
LH: loop header
LB: loop body
LE: loop exit
PB: predicated region body
PF: predicated region fallthrough
CT: control target
= control target key end

     0   :  { %13 = vsyncpa [#allocation8], 0  ;;  %s2237_s0 = inlined_call_operand.vmem [shape: f32[2,32,8], index: 0, kind: input, shape index: {}]   ;;  %s2238_s1 = inlined_call_operand.vmem [shape: f32[2,32,8], index: 1, kind: input, shape index: {}]   ;;  %s2239_s2 = inlined_call_operand.vmem [shape: f32[32,32], index: 2, kind: input, shape index: {}]   ;;  %s2240_s3 = inlined_call_operand.vmem [shape: f32[32,1], index: 3, kind: input, shape index: {}]   ;;  %s2241_s4 = inlined_call_operand.vmem [shape: f32[64,32], index: 4, kind: input, shape index: {}]   ;;  %s2242_s5 = inlined_call_operand.vmem [shape: f32[64,1], index: 5, kind: input, shape index: {}]   ;;  %s2243_s6 = inlined_call_operand.vmem [shape: f32[32,32], index: 6, kind: input, shape index: {}]   ;;  %s2244_s7 = inlined_call_operand.vmem [shape: f32[1,32], index: 7, kind: input, shape index: {}]   ;;  %s2245_s8 = inlined_call_operand.hbm [shape: f32[2,8,32], index: 8, kind: output, shape index: {}]  }
   0x1   :  { %15 = vsyncpa [#allocation8 + $0x1], 0  ;;  %s1954_s27 = smov 0   ;;  %s1956_s28 = smov 0  }
   0x2   :  { %s1958_s29 = smov 0   ;;  %s1960_s30 = smov 0  }
   0x3   :  { %s1962_s9 = smov 0   ;;  %s1964_s10 = smov 0  }
   0x4 LB: > { %2248 = sst [smem:[#allocation10_spill]] %s1896_s9  ;;  %s1561_s11 = sadd.s32 4294967295, %s1900_s10   ;;  %s1900_s10 = sphi %s1964_s10, %s21_s10   ;;  %s1896_s9 = sphi %s1962_s9, %s2253_s9   ;;  %s1892_s30 = sphi %s1960_s30, %s2252_s30   ;;  %s1888_s29 = sphi %s1958_s29, %s2256_s29   ;;  %s1884_s28 = sphi %s1956_s28, %s2255_s28   ;;  %s1880_s27 = sphi %s1954_s27, %s2254_s27  }
   0x5   : > { %s1562_s12 = sadd.s32 4294967294, %s1900_s10   ;;  %s40_s13 = sadd.s32 1, %s1896_s9 }
   0x6   : > { %s231_s14 = sadd.s32 1, %s1888_s29  ;;  %p42_p0 = scmp.ge.s32.totalorder %s40_s13, 2 }
   0x7   : > { %p241_p1 = scmp.ne.s32.totalorder %s1888_s29, %s1884_s28  ;;  %p242_p2 = scmp.eq.s32.totalorder %s1561_s11, 1 }
   0x8   : > { %p247_p3 = scmp.ne.s32.totalorder %s1884_s28, %s1880_s27  ;;  %s2258_s13 = smov (%p42_p0, %s40_s13), 0 }
   0x9   : > { %2249 = sst [smem:[#allocation11_spill]] %s2258_s13  ;;  %p1994_p4 = por %p242_p2, %p241_p1 }
   0xa   : > { %p248_p5 = scmp.eq.s32.totalorder %s1562_s12, 1  ;;  %s226_s16 = ssub.s32 %s1896_s9, %s2258_s13 }
   0xb   : > { %p1565_p6 = scmp.ge.s32.totalorder %s1900_s10, 1  ;;  %p229_p7 = scmp.eq.s32.totalorder %s226_s16, 0 }
   0xc   : > { %p2001_p8 = por %p248_p5, %p247_p3  ;;  %p306_p9 = scmp.lt.s32.totalorder %s1900_s10, 3 }
   0xd   : > { %s2007_s18 = scalar_select %p229_p7, %s1888_s29, %s231_s14  }
   0xe   : > { %p307_p10 = pnand %p1565_p6, %p306_p9 }
   0xf   : > { %p351_p11 = scmp.lt.s32.totalorder (!%p307_p10), %s1892_s30, 1  ;;  %v371_v0 = vld [vmem:[%s2239_s2] sm:$0xff] (!%p307_p10)  ;;  %vm403_vm0 = vcmask (!%p307_p10), 261120   ;;  %v1902_v2 = vmov (!%p307_p10), 0   ;;  %v529_v4 = vld [vmem:[%s2242_s5 + $0x10] sm:$0xff] (!%p307_p10)  ;;  %v528_v5 = vld [vmem:[%s2242_s5 + $0x8] sm:$0xff] (!%p307_p10) }
  0x10   : > { %310 = sbr.rel (%p307_p10) target bundleno = 1222 (0x4c6), region = 52  ;;  %v515_v1 = vld [vmem:[%s2241_s4] sm:$0xff] (!%p307_p10)  ;;  %1648 = vmatprep.mubr.msk.f32.mxu0 (!%p307_p10), %vm403_vm0, %v371_v0  ;;  %1808 = vset.pattern.permute.xlu0 (!%p307_p10), %v1902_v2  ;;  %v530_v6 = vld [vmem:[%s2242_s5 + $0x18] sm:$0xff] (!%p307_p10)  ;;  %v380_v20 = vld [vmem:[%s2240_s3 + $0x8] sm:$0xff] (!%p307_p10)  ;;  %v1903_v33 = vmov (!%p307_p10), 0.0|0.0   ;;  %vm501_vm1 = vcmask (!%p307_p10), 64512  }
  0x11   : > { %1662 = vmatprep.mubr.msk.f32.mxu1 (!%p307_p10), %vm403_vm0, %v515_v1  ;;  %v527_v3 = vld [vmem:[%s2242_s5] sm:$0xff] (!%p307_p10)  ;;  %1809 = vset.pattern.permute.xlu1 (!%p307_p10), %v1902_v2  ;;  %v381_v21 = vld [vmem:[%s2240_s3 + $0x10] sm:$0xff] (!%p307_p10)  ;;  %v372_v22 = vld [vmem:[%s2239_s2 + $0x8] sm:$0xff] (!%p307_p10)  ;;  %vm1904_vm2 = vmmov (!%p307_p10), 0   ;;  %v1905_v34 = vmov (!%p307_p10), 0.0   ;;  %vm506_vm3 = vcmask (!%p307_p10), 57344  }
  0x12   : > { %537 = vperm.xlu0 (!%p307_p10), %1808, %v527_v3   ;;  %547 = vperm.xlu1 (!%p307_p10), %1809, %v529_v4   ;;  %v379_v19 = vld [vmem:[%s2240_s3] sm:$0xff] (!%p307_p10)  ;;  %v382_v23 = vld [vmem:[%s2240_s3 + $0x18] sm:$0xff] (!%p307_p10)  ;;  %v516_v24 = vld [vmem:[%s2241_s4 + $0x8] sm:$0xff] (!%p307_p10)  ;;  %511 = vst.msk [vmem:[#allocation5] sm:$0xff] (!%p307_p10), %vm501_vm1, %v1905_v34  ;;  %vm741_vm4 = vcmask (!%p307_p10), 130048   ;;  %s348_s9 = sand.u32 (!%p307_p10), 1, %s1884_s28  }
  0x13   : > { %v373_v25 = vld [vmem:[%s2239_s2 + $0x10] sm:$0xff] (!%p307_p10)  ;;  %v374_v27 = vld [vmem:[%s2239_s2 + $0x18] sm:$0xff] (!%p307_p10)  ;;  %v519_v29 = vld [vmem:[%s2241_s4 + $0x20] sm:$0xff] (!%p307_p10)  ;;  %512 = vst.msk [vmem:[#allocation5 + $0x8] sm:$0xff] (!%p307_p10), %vm501_vm1, %v1905_v34  ;;  %s1566_s26 = sshll.u32 (!%p307_p10), %s348_s9, 3  ;;  %s1594_s14 = sshll.u32 (!%p307_p10), %s1892_s30, 7 }
  0x14   : > { %v517_v26 = vld [vmem:[%s2241_s4 + $0x10] sm:$0xff] (!%p307_p10)  ;;  %v518_v28 = vld [vmem:[%s2241_s4 + $0x18] sm:$0xff] (!%p307_p10)  ;;  %v520_v30 = vld [vmem:[%s2241_s4 + $0x28] sm:$0xff] (!%p307_p10)  ;;  %513 = vst.msk [vmem:[#allocation5 + $0x10] sm:$0xff] (!%p307_p10), %vm501_vm1, %v1905_v34  ;;  %s350_s16 = scalar_lea.vmem (!%p307_p10), [#allocation7], %s1566_s26  ;;  %s2189_s22 = scalar_lea.hbm (!%p307_p10), %s2245_s8, %s1594_s14 }
  0x15   : > { %v521_v31 = vld [vmem:[%s2241_s4 + $0x30] sm:$0xff] (!%p307_p10)  ;;  %v522_v32 = vld [vmem:[%s2241_s4 + $0x38] sm:$0xff] (!%p307_p10)  ;;  %514 = vst.msk [vmem:[#allocation5 + $0x18] sm:$0xff] (!%p307_p10), %vm501_vm1, %v1905_v34  ;;  %v532_v2 = vld [vmem:[%s2242_s5 + $0x28] sm:$0xff] (!%p307_p10)  ;;  %s1466_s19 = sshll.u32 (!%p307_p10), %s350_s16, 4  ;;  %s2191_s19 = int_to_ptr.vmem [resolvable:$true] %s1466_s19 }
  0x16   : > { %542 = vperm.xlu0 (!%p307_p10), %1808, %v528_v5   ;;  %552 = vperm.xlu1 (!%p307_p10), %1809, %v530_v6   ;;  %v534_v4 = vld [vmem:[%s2242_s5 + $0x38] sm:$0xff] (!%p307_p10)  ;;  %v531_v6 = vld [vmem:[%s2242_s5 + $0x20] sm:$0xff] (!%p307_p10)  ;;  %509 = vst.msk [vmem:[#allocation4] sm:$0x1] (!%p307_p10), %vm506_vm3, %v1905_v34  ;;  %510 = vst.msk [vmem:[#allocation4 + $0x1] sm:$0x1] (!%p307_p10), %vm506_vm3, %v1905_v34 }
  0x17   : > { %s352_s23 = scalar_select %p351_p11, %s1892_s30, 1 }
  0x18   : > { %s1822_s25 = scalar_lea.vmem %s2191_s19, 128  ;;  %s1908_s30 = smov [#allocation7]  }
  0x19   : > { %s1597_s12 = sshll.u32 %s352_s23, 5  ;;  %p1823_p12 = scmp.ne.s32.totalorder %s2191_s19, %s1822_s25 }
  0x1a   : > { %s358_s21 = scalar_lea.vmem %s2237_s0, %s1597_s12  ;;  %s366_s24 = scalar_lea.vmem %s2238_s1, %s1597_s12  ;;  %385 = vperm.xlu0 %1808, %v379_v19   ;;  %390 = vperm.xlu1 %1809, %v380_v20  }
  0x1b   : > { %v375_v7 = vld [vmem:[%s358_s21] sm:$0xff]  ;;  %v376_v8 = vld [vmem:[%s358_s21 + $0x8] sm:$0xff]  ;;  %v377_v12 = vld [vmem:[%s358_s21 + $0x10] sm:$0xff]  ;;  %p1824_p13 = pnand %p1823_p12, %p1994_p4  ;;  %s1826_s13 = sshll.u32 %s1908_s30, 4  ;;  %s1827_s13 = int_to_ptr.vmem [resolvable:$false] %s1826_s13 }
  0x1c   : > { %v523_v9 = vld [vmem:[%s366_s24] sm:$0xff]  ;;  %v1719_v10 = vpack.c.bf16 %v376_v8, %v375_v7  ;;  %v524_v11 = vld [vmem:[%s366_s24 + $0x8] sm:$0xff]  ;;  %v378_v13 = vld [vmem:[%s358_s21 + $0x18] sm:$0xff]  ;;  %s1828_s23 = scalar_lea.vmem %s1827_s13, 256  ;;  %p1829_p1 = scmp.lt.s32.totalorder %s2191_s19, %s1827_s13 }
  0x1d   : > { %v1727_v14 = vpack.c.bf16 %v524_v11, %v523_v9  ;;  %v1723_v15 = vpack.c.bf16 %v378_v13, %v377_v12  ;;  %v525_v16 = vld [vmem:[%s366_s24 + $0x10] sm:$0xff]  ;;  %v526_v17 = vld [vmem:[%s366_s24 + $0x18] sm:$0xff]  ;;  %v1906_v9 = vmov -inf   ;;  %s1452_s24 = scalar_lea.sflag [#allocation8], %s348_s9  ;;  %p1825_p0 = pneg %p1824_p13 }
  0x1e   : > { %1720 = vmatprep.subr.bf16.mxu0 %v1719_v10  ;;  %v1731_v18 = vpack.c.bf16 %v526_v17, %v525_v16  ;;  %395 = vperm.xlu0 %1808, %v381_v21   ;;  %v533_v8 = vld [vmem:[%s2242_s5 + $0x30] sm:$0xff]  ;;  %507 = vst.msk [vmem:[#allocation3] sm:$0x1] %vm506_vm3, %v1906_v9  ;;  %508 = vst.msk [vmem:[#allocation3 + $0x1] sm:$0x1] %vm506_vm3, %v1906_v9  ;;  %v947_v17 = vlaneseq  ;;  %p1830_p2 = scmp.lt.s32.totalorder %s1828_s23, %s1822_s25 }
  0x1f   : > { %1728 = vmatprep.subr.bf16.mxu1 %v1727_v14  ;;  %1722 = vmatpush3.bf16.msra.mxu0 %v1719_v10 }
  0x20   : > { %1730 = vmatpush3.bf16.msra.mxu1 %v1727_v14  ;;  %1724 = vmatprep.subr.bf16.mxu0 %v1723_v15  ;;  %p1831_p3 = por %p1830_p2, %p1829_p1 }
  0x21   : > { %1732 = vmatprep.subr.bf16.mxu1 %v1731_v18  ;;  %400 = vperm.xlu1 %1809, %v382_v23  }
  0x22   : > { %p1832_p5 = pnand %p1831_p3, %p1825_p0 }
  0x23   : > { %1726 = vmatpush3.bf16.msra.mxu0 %v1723_v15 }
  0x24   : > { %1734 = vmatpush3.bf16.msra.mxu1 %v1731_v18  ;;  %1738 = vmatprep.subr.bf16.mxu0 %v1903_v33 }
  0x25   : > { %1735 = vmatprep.subr.bf16.mxu1 %v1903_v33 }
  0x26   : > { %1649 = vmatmul.mubr.msk.f32.vlgmr.msra.gmra.mrb[0].mxu0 %vm403_vm0, %v372_v22 }
  0x27   : > { %1663 = vmatmul.mubr.msk.f32.vlgmr.msra.gmra.mrb[0].mxu1 %vm403_vm0, %v516_v24  ;;  %1651 = vmatprep.mubr.msk.f32.mxu0 %vm403_vm0, %v373_v25  ;;  %v948_v24 = vshrl.u32 %v947_v17, 7  ;;  %v1280_v17 = vld [vmem:[#allocation5 + $0x18] sm:$0xff] }
  0x28   : > { %1665 = vmatprep.mubr.msk.f32.mxu1 %vm403_vm0, %v517_v26 }
  0x2a   : > { %1652 = vmatmul.mubr.msk.f32.gmra.mrb[2].mxu0 %vm403_vm0, %v374_v27 }
  0x2b   : > { %1666 = vmatmul.mubr.msk.f32.gmra.mrb[2].mxu1 %vm403_vm0, %v518_v28  ;;  %1685 = vmatprep.mubr.msk.f32.mxu0 %vm1904_vm2, %v1905_v34  ;;  %v920_v28 = vld [vmem:[#allocation3] sm:$0x1] }
  0x2c   : > { %1668 = vmatprep.mubr.msk.f32.mxu1 %vm403_vm0, %v519_v29 }
  0x2f   : > { %1669 = vmatmul.mubr.msk.f32.gmra.mrb[4].mxu1 %vm403_vm0, %v520_v30  ;;  %v2139_v30 = vsub.s32 0, %v948_v24 }
  0x30   : > { %1671 = vmatprep.mubr.msk.f32.mxu1 %vm403_vm0, %v521_v31 }
  0x33   : > { %1672 = vmatmul.mubr.msk.f32.gmra.mrb[6].mxu1 %vm403_vm0, %v522_v32 }
  0x34   : > { %1678 = vmatprep.mubr.msk.f32.mxu1 %vm1904_vm2, %v1905_v34 }
  0x91   : > { %v548_v35 = vpop.permute.xlu1 %547  ;;  %v538_v36 = vpop.permute.xlu0 %537 }
  0x95   : > { %v553_v37 = vpop.permute.xlu1 %552  ;;  %v543_v38 = vpop.permute.xlu0 %542 }
  0x99   : > { %v391_v39 = vpop.permute.xlu1 %390  ;;  %v386_v40 = vpop.permute.xlu0 %385 }
  0x9d   : > { %v396_v49 = vpop.permute.xlu0 %395 }
  0xa0   : > { %v401_v47 = vpop.permute.xlu1 %400 }
  0xf9   : > { %v1650_v41 = vpop.f32.mrb[0].mxu0 }
  0xfa   : > { %v1664_v42 = vpop.f32.mrb[0].mxu1  ;;  %v488_v43 = vadd.f32 %v1650_v41, %v391_v39  ;;  %v482_v44 = vpop.f32.mrb[1].mxu0 }
  0xfb   : > { %v483_v45 = vadd.f32 %v482_v44, %v386_v40  ;;  %v666_v46 = vpop.f32.mrb[1].mxu1  ;;  %v672_v56 = vadd.f32 %v1664_v42, %v543_v38 }
  0xfc   : > { %503 = vst.msk [vmem:[#allocation2 + $0x8] sm:$0xff] %vm501_vm1, %v488_v43  ;;  %v667_v48 = vadd.f32 %v666_v46, %v538_v36  ;;  %v921_v36 = vld [vmem:[#allocation3 + $0x1] sm:$0x1] }
  0xfd   : > { %502 = vst.msk [vmem:[#allocation2] sm:$0xff] %vm501_vm1, %v483_v45  ;;  %v1653_v50 = vpop.f32.mrb[2].mxu0 }
  0xfe   : > { %v1667_v51 = vpop.f32.mrb[2].mxu1  ;;  %709 = vxpose.xlu0.b32.start [1/2] (short) (narrow) %v667_v48, 8  ;;  %v498_v52 = vadd.f32 %v1653_v50, %v401_v47  ;;  %v492_v53 = vpop.f32.mrb[3].mxu0 }
  0xff   : > { %v493_v54 = vadd.f32 %v492_v53, %v396_v49  ;;  %v676_v55 = vpop.f32.mrb[3].mxu1  ;;  %v682_v58 = vadd.f32 %v1667_v51, %v553_v37 }
 0x100   : > { %505 = vst.msk [vmem:[#allocation2 + $0x18] sm:$0xff] %vm501_vm1, %v498_v52  ;;  %v677_v57 = vadd.f32 %v676_v55, %v548_v35  ;;  %v1907_v52 = vmov 1.0  }
 0x101   : > { %504 = vst.msk [vmem:[#allocation2 + $0x10] sm:$0xff] %vm501_vm1, %v493_v54 }
 0x102   : > { %815 = vxpose.xlu1.b32.start [1/2] (short) (narrow) %v677_v57, 8  ;;  %710 = vxpose.xlu0.b32.end [2/2] (short) (narrow) %v672_v56, 8  ;;  %v2107_v60 = vpop.f32.mrb[4].mxu1 }
 0x103   : > { %v706_v59 = vld [vmem:[#allocation2 + $0x8] sm:$0xff]  ;;  %v686_v3 = vpop.f32.mrb[5].mxu1 }
 0x104   : > { %v705_v61 = vld [vmem:[#allocation2] sm:$0xff] }
 0x105   : > { %v1736_v62 = vpack.c.bf16 %v706_v59, %v705_v61  ;;  %v1335_v59 = vld [vmem:[%s2243_s6 + $0x8] sm:$0xff] }
 0x106   : > { %816 = vxpose.xlu1.b32.end [2/2] (short) (narrow) %v682_v58, 8  ;;  %v2117_v5 = vpop.f32.mrb[6].mxu1  ;;  %v1334_v58 = vld [vmem:[%s2243_s6] sm:$0xff] }
 0x107   : > { %1737 = vmatpush3.bf16.msra.mxu1 %v1736_v62  ;;  %v708_v63 = vld [vmem:[#allocation2 + $0x18] sm:$0xff]  ;;  %v2122_v7 = vpop.f32.mrb[7].mxu1  ;;  %v1742_v61 = vpack.c.bf16 %v1335_v59, %v1334_v58 }
 0x108   : > { %v707_v0 = vld [vmem:[#allocation2 + $0x10] sm:$0xff]  ;;  %1693 = vmatprep.subr.mxu1 %v1905_v34  ;;  %v1337_v62 = vld [vmem:[%s2243_s6 + $0x18] sm:$0xff] }
 0x109   : > { %v1739_v1 = vpack.c.bf16 %v708_v63, %v707_v0 }
 0x10b   : > { %1740 = vmatpush3.bf16.msra.mxu0 %v1739_v1 }
 0x10c   : > { %1688 = vmatprep.subr.mxu0 %v1905_v34 }
 0x124   : > { %562 = vperm.xlu1 %1809, %v532_v2   ;;  %v1268_v2 = vld [vmem:[#allocation4] sm:$0x1] }
 0x128   : > { %572 = vperm.xlu1 %1809, %v534_v4  }
 0x12b   : > { %557 = vperm.xlu0 %1808, %v531_v6  }
 0x12f   : > { %567 = vperm.xlu0 %1808, %v533_v8   ;;  %v1278_v8 = vld [vmem:[#allocation5 + $0x8] sm:$0xff] }
 0x17e   : > { %v725_v10 = vpop.trf.xlu0 }
 0x17f   : > { %1679 = vmatmul.mubr.msk.f32.vlgmr.msra.gmra.mrb[8].mxu1 %vm741_vm4, %v725_v10 }
 0x180   : > { %1695 = vmatprep.mubr.msk.f32.mxu1 %vm1904_vm2, %v1905_v34 }
 0x182   : > { %v831_v11 = vpop.trf.xlu1 }
 0x183   : > { %1686 = vmatmul.mubr.msk.f32.vlgmr.msra.gmra.mrb[4].mxu0 %vm741_vm4, %v831_v11  ;;  %v1277_v11 = vld [vmem:[#allocation5] sm:$0xff] }
 0x184   : > { %1690 = vmatprep.mubr.msk.f32.mxu0 %vm1904_vm2, %v1905_v34 }
 0x1a3   : > { %v563_v48 = vpop.permute.xlu1 %562 }
 0x1a4   : > { %v692_v54 = vadd.f32 %v2107_v60, %v563_v48  ;;  %v1336_v60 = vld [vmem:[%s2243_s6 + $0x10] sm:$0xff]  ;;  %v1591_v48 = vld [vmem:[%s2244_s7] ss:$0 sm:$0xff] }
 0x1a7   : > { %v573_v55 = vpop.permute.xlu1 %572 }
 0x1a8   : > { %v702_v57 = vadd.f32 %v2117_v5, %v573_v55 }
 0x1aa   : > { %v558_v47 = vpop.permute.xlu0 %557 }
 0x1ab   : > { %v687_v50 = vadd.f32 %v686_v3, %v558_v47 }
 0x1ae   : > { %v568_v51 = vpop.permute.xlu0 %567 }
 0x1af   : > { %v697_v56 = vadd.f32 %v2122_v7, %v568_v51  ;;  %v1269_v7 = vld [vmem:[#allocation4 + $0x1] sm:$0x1] }
 0x252   : > { %v811_v12 = vpop.f32.mrb[8].mxu1 }
 0x253   : > { %v923_v13 = vsel %vm501_vm1, %v811_v12, -inf  ;;  %v1680_v14 = vpop.f32.mrb[9].mxu1 }
 0x254   : > { %v924_v15 = vrot.slane %v923_v13, 4 }
 0x256   : > { %v925_v16 = vmax.f32 %v923_v13, %v924_v15  ;;  %v916_v18 = vpop.f32.mrb[4].mxu0 }
 0x257   : > { %v930_v19 = vsel %vm501_vm1, %v916_v18, -inf  ;;  %v1687_v20 = vpop.f32.mrb[5].mxu0 }
 0x258   : > { %v926_v21 = vrot.slane %v925_v16, 2  ;;  %v931_v22 = vrot.slane %v930_v19, 4 }
 0x25a   : > { %v927_v23 = vmax.f32 %v925_v16, %v926_v21  ;;  %v932_v25 = vmax.f32 %v930_v19, %v931_v22  ;;  %v1279_v22 = vld [vmem:[#allocation5 + $0x10] sm:$0xff] }
 0x25c   : > { %v928_v26 = vrot.slane %v927_v23, 1  ;;  %v933_v27 = vrot.slane %v932_v25, 2 }
 0x25e   : > { %v929_v29 = vmax.f32 %v927_v23, %v928_v26  ;;  %v934_v31 = vmax.f32 %v932_v25, %v933_v27 }
 0x260   : > { %v937_v32 = vmax.f32 %v920_v28, %v929_v29  ;;  %v935_v35 = vrot.slane %v934_v31, 1 }
 0x262   : > { %v939_v37 = vsub.f32 %v920_v28, %v937_v32  ;;  %v950_v38 = vrot.slane %v937_v32, %v2139_v30  ;;  %1305 = vst.msk [vmem:[#allocation3] sm:$0x1] %vm506_vm3, %v937_v32  ;;  %v936_v39 = vmax.f32 %v934_v31, %v935_v35 }
 0x264   : > { %v957_v40 = vsub.f32 %v811_v12, %v950_v38  ;;  %v938_v41 = vmax.f32 %v921_v36, %v936_v39  ;;  %v941_v63 = vmul.f32 1.442695, %v939_v37 }
 0x266   : > { %v959_v42 = vmul.f32 1.442695, %v957_v40  ;;  %v940_v43 = vsub.f32 %v921_v36, %v938_v41  ;;  %v954_v44 = vrot.slane %v938_v41, %v2139_v30  ;;  %1306 = vst.msk [vmem:[#allocation3 + $0x1] sm:$0x1] %vm506_vm3, %v938_v41 }
 0x268   : > { %1810 = vpow2.f32 %v959_v42  ;;  %v958_v45 = vsub.f32 %v916_v18, %v954_v44  ;;  %v943_v0 = vmul.f32 1.442695, %v940_v43 }
 0x26a   : > { %v961_v46 = vmul.f32 1.442695, %v958_v45 }
 0x26c   : > { %1812 = vpow2.f32 %v961_v46 }
 0x26d   : > { %1814 = vpow2.f32 %v941_v63 }
 0x26e   : > { %1816 = vpow2.f32 %v943_v0 }
 0x272   : > { %v1811_v49 = vpop.eup %1810 }
 0x273   : > { %1689 = vmatpush3.msra.mxu0 %v1811_v49 }
 0x274   : > { %1691 = vmatmul.mubr.msk.f32.vlgmr.msra.gmra.mrb[6].mxu0 %vm501_vm1, %v1907_v52  ;;  %1698 = vmatprep.subr.mxu0 %v1811_v49 }
 0x275   : > { %1699 = vmatpush3.msra.mxu0 %v1811_v49  ;;  %1700 = vmatprep.mubr.msk.f32.mxu0 %vm501_vm1, %v687_v50 }
 0x276   : > { %v1813_v53 = vpop.eup %1812  ;;  %1741 = vmatprep.subr.bf16.mxu0 %v1903_v33 }
 0x277   : > { %1694 = vmatpush3.msra.mxu1 %v1813_v53  ;;  %v1815_v1 = vpop.eup %1814 }
 0x278   : > { %1696 = vmatmul.mubr.msk.f32.vlgmr.msra.gmra.mrb[10].mxu1 %vm501_vm1, %v1907_v52  ;;  %1701 = vmatmul.mubr.msk.f32.vlgmr.msra.gmra.mrb[8].mxu0 %vm501_vm1, %v692_v54  ;;  %v1270_v3 = vmul.f32 %v1815_v1, %v1268_v2  ;;  %v1286_v4 = vrot.slane %v1815_v1, %v2139_v30  ;;  %v1817_v5 = vpop.eup %1816 }
 0x279   : > { %1703 = vmatprep.subr.mxu1 %v1813_v53  ;;  %1705 = vmatprep.mubr.msk.f32.mxu1 %vm501_vm1, %v697_v56  ;;  %v1290_v13 = vrot.slane %v1817_v5, %v2139_v30 }
 0x27a   : > { %1704 = vmatpush3.msra.mxu1 %v1813_v53  ;;  %1716 = vmatprep.mubr.msk.f32.mxu0 %vm1904_vm2, %v1905_v34  ;;  %v1745_v34 = vpack.c.bf16 %v1337_v62, %v1336_v60  ;;  %v1294_v12 = vmul.f32 %v1286_v4, %v1278_v8  ;;  %v1293_v16 = vmul.f32 %v1286_v4, %v1277_v11 }
 0x27b   : > { %1743 = vmatpush3.bf16.msra.mxu0 %v1742_v61  ;;  %v1296_v24 = vmul.f32 %v1290_v13, %v1280_v17  ;;  %v1295_v26 = vmul.f32 %v1290_v13, %v1279_v22 }
 0x27c   : > { %1706 = vmatmul.mubr.msk.f32.vlgmr.msra.gmra.mrb[12].mxu1 %vm501_vm1, %v702_v57  ;;  %1744 = vmatprep.subr.bf16.mxu0 %v1903_v33  ;;  %v1271_v33 = vmul.f32 %v1817_v5, %v1269_v7 }
 0x27f   : > { %1746 = vmatpush3.bf16.msra.mxu0 %v1745_v34 }
 0x347   : > { %v1032_v6 = vpop.f32.mrb[6].mxu0 }
 0x348   : > { %v1272_v9 = vadd.f32 %v1270_v3, %v1032_v6  ;;  %v1692_v10 = vpop.f32.mrb[7].mxu0 }
 0x34a   : > { %1275 = vst.msk [vmem:[#allocation4] sm:$0x1] %vm506_vm3, %v1272_v9 }
 0x34b   : > { %v1102_v14 = vpop.f32.mrb[10].mxu1  ;;  %v1702_v15 = vpop.f32.mrb[8].mxu0 }
 0x34c   : > { %v1273_v18 = vadd.f32 %v1271_v33, %v1102_v14  ;;  %v1298_v19 = vadd.f32 %v1702_v15, %v1294_v12  ;;  %v1178_v20 = vpop.f32.mrb[9].mxu0  ;;  %v1697_v21 = vpop.f32.mrb[11].mxu1 }
 0x34d   : > { %v1297_v23 = vadd.f32 %v1293_v16, %v1178_v20 }
 0x34e   : > { %1276 = vst.msk [vmem:[#allocation4 + $0x1] sm:$0x1] %vm506_vm3, %v1273_v18 }
 0x34f   : > { %1302 = vst.msk [vmem:[#allocation5 + $0x8] sm:$0xff] %vm501_vm1, %v1298_v19  ;;  %1301 = vst.msk [vmem:[#allocation5] sm:$0xff] %vm501_vm1, %v1297_v23  ;;  %v1707_v25 = vpop.f32.mrb[12].mxu1 }
 0x350   : > { %v1300_v27 = vadd.f32 %v1707_v25, %v1296_v24  ;;  %v1259_v28 = vpop.f32.mrb[13].mxu1 }
 0x351   : > { %v1299_v29 = vadd.f32 %v1295_v26, %v1259_v28  ;;  %v1310_v31 = vld [vmem:[#allocation4] sm:$0x1] }
 0x352   : > { %1304 = vst.msk [vmem:[#allocation5 + $0x18] sm:$0xff] %vm501_vm1, %v1300_v27  ;;  %1818 = vrcp.f32 %v1310_v31 }
 0x353   : > { %1303 = vst.msk [vmem:[#allocation5 + $0x10] sm:$0xff] %vm501_vm1, %v1299_v29 }
 0x355   : > { %v1311_v32 = vld [vmem:[#allocation4 + $0x1] sm:$0x1] }
 0x356   : > { %1820 = vrcp.f32 %v1311_v32  ;;  %v1314_v37 = vld [vmem:[#allocation5] sm:$0xff]  ;;  %v1315_v40 = vld [vmem:[#allocation5 + $0x8] sm:$0xff] }
 0x359   : > { %v1317_v45 = vld [vmem:[#allocation5 + $0x18] sm:$0xff] }
 0x35a   : > { %v1316_v43 = vld [vmem:[#allocation5 + $0x10] sm:$0xff] }
 0x35c   : > { %v1819_v35 = vpop.eup %1818 }
 0x35d   : > { %v1323_v36 = vrot.slane %v1819_v35, %v2139_v30 }
 0x35f   : > { %v1330_v38 = vmul.f32 %v1323_v36, %v1314_v37  ;;  %v1331_v41 = vmul.f32 %v1323_v36, %v1315_v40 }
 0x360   : > { %v1821_v39 = vpop.eup %1820 }
 0x361   : > { %1345 = vxpose.xlu0.b32.start [1/4] (short) (narrow) %v1330_v38, 8  ;;  %v1327_v42 = vrot.slane %v1821_v39, %v2139_v30 }
 0x363   : > { %v1332_v44 = vmul.f32 %v1327_v42, %v1316_v43  ;;  %v1333_v46 = vmul.f32 %v1327_v42, %v1317_v45 }
 0x365   : > { %1346 = vxpose.xlu0.b32.cont [2/4] (short) (narrow) %v1331_v41, 8 }
 0x369   : > { %1347 = vxpose.xlu0.b32.cont [3/4] (short) (narrow) %v1332_v44, 8 }
 0x36d   : > { %1348 = vxpose.xlu0.b32.end [4/4] (short) (narrow) %v1333_v46, 8 }
 0x3e1   : > { %v1361_v47 = vpop.trf.xlu0 }
 0x3e2   : > { %1717 = vmatmul.mubr.msk.f32.vlgmr.msra.gmra.mrb[10].mxu0 %vm403_vm0, %v1361_v47 }
 0x4b5   : > { %v1446_v30 = vpop.f32.mrb[10].mxu0 }
 0x4b6   : > { %v1447_v49 = vadd.f32 %v1591_v48, %v1446_v30  ;;  %v1718_v50 = vpop.f32.mrb[11].mxu0 }
 0x4b8   : > { %1450 = vst.msk [vmem:[%s350_s16] sm:$0xff] %vm403_vm0, %v1447_v49 }
 0x4b9   : > { %1835 = shalt.err (!%p1832_p5)
}
 0x4ba   : > { %s1836_s9 = scalar_lea.hbm %s2189_s22, 128  ;;  %s1840_s12 = scalar_lea.hbm %s2245_s8, 256 }
 0x4bb   : > { %p1837_p6 = scmp.ne.s32.totalorder %s2189_s22, %s1836_s9  ;;  %p1841_p10 = scmp.lt.u32.totalorder %s2189_s22, %s2245_s8 }
 0x4bc   : > { %p1842_p11 = scmp.lt.u32.totalorder %s1840_s12, %s1836_s9  ;;  %p1844_p13 = scmp.lt.u32.totalorder %s1836_s9, %s2189_s22 }
 0x4bd   : > { %p1838_p7 = pnand %p1837_p6, %p1994_p4 }
 0x4be   : > { %p1843_p12 = por %p1842_p11, %p1841_p10 }
 0x4bf   : > { %p1839_p9 = pneg %p1838_p7 }
 0x4c0   : > { %p1845_p0 = por %p1844_p13, %p1843_p12 }
 0x4c2   : > { %p1846_p1 = pnand %p1845_p0, %p1839_p9 }
 0x4c4   : > { %1849 = shalt.err (!%p1846_p1)
}
 0x4c5   : > { %1747 = dma.vmem_to_hbm [thread:$0]  (%p1994_p4), %s2191_s19, 128, %s2189_s22, %s1452_s24  }
 0x4c6 PF: > { %p1753_p2 = scmp.ge.s32.totalorder %s1900_s10, 2  ;;  %s1478_s20 = sand.u32 1, %s1880_s27  }
 0x4c7   : > { %s1479_s21 = scalar_lea.sflag [#allocation8], %s1478_s20 }
 0x4c8   : > { %p1750_p3 = pnand %p1753_p2, %p2001_p8 }
 0x4ca   : > { %1875 = dma.done.wait (!%p1750_p3), %s1479_s21, 128  }
 0x4cb   : > { %1877 = vsyncadd (!%p1750_p3), %s1479_s21, 4294967168  ;;  %s21_s10 = sadd.s32 1, %s1900_s10   ;;  %s2252_s30 = sld [smem:[#allocation10_spill]] }
 0x4cc   : > { %p18_p5 = scmp.ge.s32.totalorder %s21_s10, 4   ;;  %s2253_s9 = sld [smem:[#allocation11_spill]] }
 0x4cd   : > { %s2254_s27 = smov %s1884_s28  ;;  %s2255_s28 = smov %s1888_s29 }
 0x4ce   : > { %s2256_s29 = smov %s2007_s18  ;;  %20 = sbr.rel (!%p18_p5) target bundleno = 4 (0x4), region = 98 }
 0x4d5   :  { %1484 = vsyncpa [#allocation8], 1 }
 0x4d6   :  { %1486 = vsyncpa [#allocation8 + $0x1], 1 }

</bundles_post_ra>
